<compile_context>
chip_gen: v5e
topology: v5e:2x2
jax: 0.10.0
libtpu: 0.0.40
codegen_flags: <defaults>
</compile_context>

<pallas_src>
import numpy as np
import jax
import jax.numpy as jnp
from jax.experimental import pallas as pl
from jax.experimental.pallas import tpu as pltpu


def _round_up(x, m):
    return ((x + m - 1) // m) * m


def tree_nn_kernel(subtrees_ref, lens_ref,                       # SMEM (scalar prefetch)
                   reps_ref, wl_ref, wr_ref, btree_ref,          # VMEM inputs
                   wc_ref, bcls_ref,
                   out_ref,                                      # VMEM out (B_TILE, O_pad)
                   reps_scratch, stage_l, stage_r, roots_scratch):
    g = pl.program_id(0)
    BT = out_ref.shape[0]
    Lp = reps_ref.shape[0] // BT               # padded nodes per example
    mxu_dtype = wl_ref.dtype

    # One whole-tile copy of this tile's node representations into f32 scratch
    # (no per-example dynamic-offset slab stores).
    reps_scratch[...] = reps_ref[...].astype(jnp.float32)

    # Hoisted loop-invariant weight / bias loads.
    w_left = wl_ref[...]                       # (E_pad, E_pad)  bf16
    w_right = wr_ref[...]                      # (E_pad, E_pad)  bf16
    bias = btree_ref[...]                      # (1, E_pad)      f32

    # tile_max = max(lens) over the tile (scalar SMEM reduction).
    tile_max = lens_ref[g * BT]
    for bt in range(1, BT):
        tile_max = jnp.maximum(tile_max, lens_ref[g * BT + bt])

    def step_body(i, carry):
        # ---- gather phase: B_TILE independent dynamic row reads ----
        parents, actives = [], []
        for bt in range(BT):                   # static, unrolled
            ex = g * BT + bt
            off = ex * (Lp * 3) + i * 3
            parent = subtrees_ref[off + 0]
            left = subtrees_ref[off + 1]
            right = subtrees_ref[off + 2]
            base = bt * Lp                     # static
            stage_l[pl.ds(bt, 1), :] = reps_scratch[pl.ds(base + left, 1), :]
            stage_r[pl.ds(bt, 1), :] = reps_scratch[pl.ds(base + right, 1), :]
            parents.append(parent)
            actives.append(jnp.logical_and(i < lens_ref[ex], left != right))

        # ---- one batched tree-layer matmul + tanh for the whole tile ----
        new_rows = jnp.tanh(
            jnp.dot(stage_l[...].astype(mxu_dtype), w_left,
                    preferred_element_type=jnp.float32)
            + jnp.dot(stage_r[...].astype(mxu_dtype), w_right,
                      preferred_element_type=jnp.float32)
            + bias)                            # (BT, E_pad) f32

        # ---- predicated per-example row scatter ----
        for bt in range(BT):                   # static, unrolled
            base = bt * Lp
            parent = parents[bt]
            row = new_rows[bt:bt + 1, :]

            @pl.when(actives[bt])
            def _(parent=parent, row=row, base=base):
                reps_scratch[pl.ds(base + parent, 1), :] = row

        return carry

    jax.lax.fori_loop(0, tile_max, step_body, 0)

    # Gather each example's root (node 0) row; one lane-dense classifier
    # matmul + one unmasked (B_TILE, O_pad) store for the whole tile.
    for bt in range(BT):
        roots_scratch[pl.ds(bt, 1), :] = reps_scratch[pl.ds(bt * Lp, 1), :]
    out_ref[...] = (jnp.dot(roots_scratch[...].astype(mxu_dtype), wc_ref[...],
                            preferred_element_type=jnp.float32)
                    + bcls_ref[...])


def tree_nn_forward(subtrees, lens, emb_inds, embedding,
                    w_tree, b_tree, w_cls, b_cls, *, b_tile=16,
                    param_dtype=jnp.bfloat16):
    B, L, _ = subtrees.shape
    V, E = embedding.shape
    O = w_cls.shape[1]

    # --- tile geometry ---
    B_TILE = min(b_tile, _round_up(max(B, 1), 8))
    # Keep >=2 grid steps when batch allows it so v7x's 2 TensorCores both work.
    if B_TILE >= 16 and _round_up(max(B, 1), B_TILE) // B_TILE == 1:
        B_TILE = max(8, _round_up(B_TILE // 2, 8))
    B_pad = _round_up(max(B, 1), B_TILE)
    L_pad = _round_up(L, 8)
    E_pad = _round_up(E, 128)                  # lane-dense rows
    O_pad = _round_up(max(O, 1), 128)          # lane-dense output

    # Validate indices in the wrapper: dynamic VMEM slicing has no bounds check.
    subtrees = jnp.clip(subtrees.astype(jnp.int32), 0, L - 1)
    lens = jnp.clip(lens.astype(jnp.int32), 0, L)
    emb_inds = jnp.clip(emb_inds.astype(jnp.int32), 0, V - 1)

    # Pad batch / node axes (padded examples have lens == 0 -> never active).
    subtrees = jnp.pad(subtrees, ((0, B_pad - B), (0, L_pad - L), (0, 0)))
    lens = jnp.pad(lens, (0, B_pad - B))
    emb_inds = jnp.pad(emb_inds, ((0, B_pad - B), (0, L_pad - L)))

    # Embedding lookup (glue, plain JAX gather), lane-dense padded, low-precision
    # HBM->VMEM storage; flattened so each grid step sees one 2D row slab.
    emb = jnp.pad(embedding.astype(param_dtype), ((0, 0), (0, E_pad - E)))
    reps0 = jnp.take(emb, emb_inds, axis=0).reshape(B_pad * L_pad, E_pad)

    # Flat 1D SMEM subtree table: index ex*(3*L_pad) + 3*i + k.
    subtrees_flat = subtrees.reshape(B_pad * L_pad * 3)

    # Weights laid out as (in, out); W_tree split into left/right halves and
    # padded per half so padded columns stay exactly zero through the tree.
    w_left = jnp.pad(w_tree[:E].astype(param_dtype),
                     ((0, E_pad - E), (0, E_pad - E)))
    w_right = jnp.pad(w_tree[E:].astype(param_dtype),
                      ((0, E_pad - E), (0, E_pad - E)))
    b_tree_p = jnp.pad(b_tree.astype(jnp.float32).reshape(1, E),
                       ((0, 0), (0, E_pad - E)))
    w_cls_p = jnp.pad(w_cls.astype(param_dtype),
                      ((0, E_pad - E), (0, O_pad - O)))
    b_cls_p = jnp.pad(b_cls.astype(jnp.float32).reshape(1, O),
                      ((0, 0), (0, O_pad - O)))

    grid_spec = pltpu.PrefetchScalarGridSpec(
        num_scalar_prefetch=2,
        grid=(B_pad // B_TILE,),
        in_specs=[
            pl.BlockSpec((B_TILE * L_pad, E_pad), lambda g, st, ln: (g, 0)),  # reps0
            pl.BlockSpec((E_pad, E_pad), lambda g, st, ln: (0, 0)),           # W_left
            pl.BlockSpec((E_pad, E_pad), lambda g, st, ln: (0, 0)),           # W_right
            pl.BlockSpec((1, E_pad), lambda g, st, ln: (0, 0)),               # b_tree
            pl.BlockSpec((E_pad, O_pad), lambda g, st, ln: (0, 0)),           # W_cls
            pl.BlockSpec((1, O_pad), lambda g, st, ln: (0, 0)),               # b_cls
        ],
        out_specs=pl.BlockSpec((B_TILE, O_pad), lambda g, st, ln: (g, 0)),
        scratch_shapes=[
            pltpu.VMEM((B_TILE * L_pad, E_pad), jnp.float32),  # node reps (f32 state)
            pltpu.VMEM((B_TILE, E_pad), jnp.float32),          # left staging
            pltpu.VMEM((B_TILE, E_pad), jnp.float32),          # right staging
            pltpu.VMEM((B_TILE, E_pad), jnp.float32),          # root reps
        ],
    )

    out = pl.pallas_call(
        tree_nn_kernel,
        out_shape=jax.ShapeDtypeStruct((B_pad, O_pad), jnp.float32),
        grid_spec=grid_spec,
        compiler_params=pltpu.CompilerParams(
            dimension_semantics=("parallel",),
            vmem_limit_bytes=32 * 1024 * 1024),
    )(subtrees_flat, lens, reps0, w_left, w_right, b_tree_p, w_cls_p, b_cls_p)

    return out[:B, :O]


def reference_forward(subtrees, lens, emb_inds, embedding,
                      w_tree, b_tree, w_cls, b_cls):
    """Pure-numpy mirror of the torch forward loop."""
    subtrees = np.asarray(subtrees)
    lens = np.asarray(lens)
    emb_inds = np.asarray(emb_inds)
    embedding = np.asarray(embedding)
    w_tree = np.asarray(w_tree)
    b_tree = np.asarray(b_tree)
    w_cls = np.asarray(w_cls)
    b_cls = np.asarray(b_cls)
    B = subtrees.shape[0]
    out = []
    for b in range(B):
        reps = embedding[emb_inds[b]].copy()
        for i in range(int(lens[b])):
            parent, left, right = (int(v) for v in subtrees[b, i])
            if left != right:
                combined = np.concatenate([reps[left], reps[right]])
                reps[parent] = np.tanh(combined @ w_tree + b_tree)
        out.append(reps[0] @ w_cls + b_cls)
    return np.stack(out)


if __name__ == "__main__":
    # Small, deterministic configuration.
    vocab_size = 20
    embed_dim = 32          # E
    hidden_dim = embed_dim * 2
    output_dim = 3          # O
    batch = 2               # B
    max_len = 8             # L (max_batch_len)

    key = jax.random.PRNGKey(0)
    k_emb, k_wt, k_bt, k_wc, k_bc = jax.random.split(key, 5)
    embedding = jax.random.normal(k_emb, (vocab_size, embed_dim), jnp.float32) * 0.5
    w_tree = jax.random.normal(k_wt, (hidden_dim, embed_dim), jnp.float32) * 0.1
    b_tree = jax.random.normal(k_bt, (embed_dim,), jnp.float32) * 0.1
    w_cls = jax.random.normal(k_wc, (embed_dim, output_dim), jnp.float32) * 0.1
    b_cls = jax.random.normal(k_bc, (output_dim,), jnp.float32) * 0.1

    # Tree structures (bottom-up, as described in the module docstring).
    subtrees = np.zeros((batch, max_len, 3), dtype=np.int32)
    lens = np.zeros((batch,), dtype=np.int32)
    emb_inds = np.zeros((batch, max_len), dtype=np.int32)

    # Example 0: leaves 2,3,4; then node 2 = f(3,4); node 0 = f(1,2).
    subtrees[0, :5] = [[2, 2, 2], [3, 3, 3], [4, 4, 4], [2, 3, 4], [0, 1, 2]]
    lens[0] = 5
    emb_inds[0, :5] = [0, 1, 5, 6, 7]

    # Example 1: leaves 3,4,5,6; node 1 = f(3,4); node 2 = f(5,6); node 0 = f(1,2).
    subtrees[1, :7] = [[3, 3, 3], [4, 4, 4], [5, 5, 5], [6, 6, 6],
                       [1, 3, 4], [2, 5, 6], [0, 1, 2]]
    lens[1] = 7
    emb_inds[1, :7] = [0, 0, 0, 2, 9, 11, 4]

    subtrees_j = jnp.asarray(subtrees)
    lens_j = jnp.asarray(lens)
    emb_inds_j = jnp.asarray(emb_inds)

    logits = tree_nn_forward(subtrees_j, lens_j, emb_inds_j, embedding,
                             w_tree, b_tree, w_cls, b_cls)
    logits = jax.block_until_ready(logits)

    ref = reference_forward(subtrees, lens, emb_inds, embedding,
                            w_tree, b_tree, w_cls, b_cls)
    assert logits.shape == (batch, output_dim)
    # bf16 params / MXU inputs -> slightly looser tolerance than pure f32.
    assert np.allclose(np.asarray(logits), ref, rtol=2e-2, atol=2e-2), (
        f"mismatch: max abs diff {np.max(np.abs(np.asarray(logits) - ref))}")

    print("KERNEL_OK")
</pallas_src>

<mosaic_0001>
module attributes {stable_mosaic.version = 11 : i64} {
  func.func @tree_nn_kernel(%arg0: i32, %arg1: memref<192xi32, #tpu.memory_space<smem>>, %arg2: memref<8xi32, #tpu.memory_space<smem>>, %arg3: memref<64x128xbf16, #tpu.memory_space<vmem>>, %arg4: memref<128x128xbf16, #tpu.memory_space<vmem>>, %arg5: memref<128x128xbf16, #tpu.memory_space<vmem>>, %arg6: memref<1x128xf32, #tpu.memory_space<vmem>>, %arg7: memref<128x128xbf16, #tpu.memory_space<vmem>>, %arg8: memref<1x128xf32, #tpu.memory_space<vmem>>, %arg9: memref<8x128xf32, #tpu.memory_space<vmem>>, %arg10: memref<64x128xf32, #tpu.memory_space<vmem>>, %arg11: memref<8x128xf32, #tpu.memory_space<vmem>>, %arg12: memref<8x128xf32, #tpu.memory_space<vmem>>, %arg13: memref<8x128xf32, #tpu.memory_space<vmem>>) attributes {dimension_semantics = [#tpu.dimension_semantics<parallel>], iteration_bounds = array<i64: 1>, scalar_prefetch = 2 : i64, scratch_operands = 4 : i64, tpu.core_type = #tpu.core_type<tc>, window_params = [{transform_indices = @transform_0, window_bounds = array<i64: 64, 128>}, {pipeline_mode = #tpu.pipeline_mode<synchronous>, transform_indices = @transform_1, window_bounds = array<i64: 128, 128>}, {pipeline_mode = #tpu.pipeline_mode<synchronous>, transform_indices = @transform_2, window_bounds = array<i64: 128, 128>}, {pipeline_mode = #tpu.pipeline_mode<synchronous>, transform_indices = @transform_3, window_bounds = array<i64: 1, 128>}, {pipeline_mode = #tpu.pipeline_mode<synchronous>, transform_indices = @transform_4, window_bounds = array<i64: 128, 128>}, {pipeline_mode = #tpu.pipeline_mode<synchronous>, transform_indices = @transform_5, window_bounds = array<i64: 1, 128>}, {transform_indices = @transform_6, window_bounds = array<i64: 8, 128>}]} {
    %c0 = arith.constant 0 : index
    %c0_0 = arith.constant 0 : index
    %0 = vector.load %arg3[%c0, %c0_0] : memref<64x128xbf16, #tpu.memory_space<vmem>>, vector<64x128xbf16>
    %1 = arith.extf %0 : vector<64x128xbf16> to vector<64x128xf32>
    %c0_1 = arith.constant 0 : index
    %c0_2 = arith.constant 0 : index
    %2 = vector.load %arg10[%c0_1, %c0_2] : memref<64x128xf32, #tpu.memory_space<vmem>>, vector<64x128xf32>
    tpu.vector_store %arg10[%c0_1, %c0_2], %1 {strides = array<i32>} : memref<64x128xf32, #tpu.memory_space<vmem>>, vector<64x128xf32>,
    %c0_3 = arith.constant 0 : index
    %c0_4 = arith.constant 0 : index
    %3 = vector.load %arg4[%c0_3, %c0_4] : memref<128x128xbf16, #tpu.memory_space<vmem>>, vector<128x128xbf16>
    %c0_5 = arith.constant 0 : index
    %c0_6 = arith.constant 0 : index
    %4 = vector.load %arg5[%c0_5, %c0_6] : memref<128x128xbf16, #tpu.memory_space<vmem>>, vector<128x128xbf16>
    %c0_7 = arith.constant 0 : index
    %c0_8 = arith.constant 0 : index
    %5 = vector.load %arg6[%c0_7, %c0_8] : memref<1x128xf32, #tpu.memory_space<vmem>>, vector<1x128xf32>
    %c8_i32 = arith.constant 8 : i32
    %6 = arith.muli %arg0, %c8_i32 : i32
    %7 = arith.index_cast %6 : i32 to index
    %8 = memref.load %arg2[%7] : memref<8xi32, #tpu.memory_space<smem>>
    %c8_i32_9 = arith.constant 8 : i32
    %9 = arith.muli %arg0, %c8_i32_9 : i32
    %c1_i32 = arith.constant 1 : i32
    %10 = arith.addi %9, %c1_i32 : i32
    %11 = arith.index_cast %10 : i32 to index
    %12 = memref.load %arg2[%11] : memref<8xi32, #tpu.memory_space<smem>>
    %13 = arith.maxsi %8, %12 : i32
    %c8_i32_10 = arith.constant 8 : i32
    %14 = arith.muli %arg0, %c8_i32_10 : i32
    %c2_i32 = arith.constant 2 : i32
    %15 = arith.addi %14, %c2_i32 : i32
    %16 = arith.index_cast %15 : i32 to index
    %17 = memref.load %arg2[%16] : memref<8xi32, #tpu.memory_space<smem>>
    %18 = arith.maxsi %13, %17 : i32
    %c8_i32_11 = arith.constant 8 : i32
    %19 = arith.muli %arg0, %c8_i32_11 : i32
    %c3_i32 = arith.constant 3 : i32
    %20 = arith.addi %19, %c3_i32 : i32
    %21 = arith.index_cast %20 : i32 to index
    %22 = memref.load %arg2[%21] : memref<8xi32, #tpu.memory_space<smem>>
    %23 = arith.maxsi %18, %22 : i32
    %c8_i32_12 = arith.constant 8 : i32
    %24 = arith.muli %arg0, %c8_i32_12 : i32
    %c4_i32 = arith.constant 4 : i32
    %25 = arith.addi %24, %c4_i32 : i32
    %26 = arith.index_cast %25 : i32 to index
    %27 = memref.load %arg2[%26] : memref<8xi32, #tpu.memory_space<smem>>
    %28 = arith.maxsi %23, %27 : i32
    %c8_i32_13 = arith.constant 8 : i32
    %29 = arith.muli %arg0, %c8_i32_13 : i32
    %c5_i32 = arith.constant 5 : i32
    %30 = arith.addi %29, %c5_i32 : i32
    %31 = arith.index_cast %30 : i32 to index
    %32 = memref.load %arg2[%31] : memref<8xi32, #tpu.memory_space<smem>>
    %33 = arith.maxsi %28, %32 : i32
    %c8_i32_14 = arith.constant 8 : i32
    %34 = arith.muli %arg0, %c8_i32_14 : i32
    %c6_i32 = arith.constant 6 : i32
    %35 = arith.addi %34, %c6_i32 : i32
    %36 = arith.index_cast %35 : i32 to index
    %37 = memref.load %arg2[%36] : memref<8xi32, #tpu.memory_space<smem>>
    %38 = arith.maxsi %33, %37 : i32
    %c8_i32_15 = arith.constant 8 : i32
    %39 = arith.muli %arg0, %c8_i32_15 : i32
    %c7_i32 = arith.constant 7 : i32
    %40 = arith.addi %39, %c7_i32 : i32
    %41 = arith.index_cast %40 : i32 to index
    %42 = memref.load %arg2[%41] : memref<8xi32, #tpu.memory_space<smem>>
    %43 = arith.maxsi %38, %42 : i32
    %c0_i32 = arith.constant 0 : i32
    %c0_i32_16 = arith.constant 0 : i32
    %44 = arith.subi %43, %c0_i32_16 : i32
    %45 = arith.addi %c0_i32_16, %44 : i32
    %c1_i32_17 = arith.constant 1 : i32
    scf.for %arg14 = %c0_i32_16 to %45 step %c1_i32_17  : i32 {
      %c8_i32_44 = arith.constant 8 : i32
      %70 = arith.muli %arg0, %c8_i32_44 : i32
      %c0_i32_45 = arith.constant 0 : i32
      %71 = arith.addi %70, %c0_i32_45 : i32
      %c24_i32 = arith.constant 24 : i32
      %72 = arith.muli %71, %c24_i32 : i32
      %c3_i32_46 = arith.constant 3 : i32
      %73 = arith.muli %arg14, %c3_i32_46 : i32
      %74 = arith.addi %72, %73 : i32
      %c0_i32_47 = arith.constant 0 : i32
      %75 = arith.addi %74, %c0_i32_47 : i32
      %76 = arith.index_cast %75 : i32 to index
      %77 = memref.load %arg1[%76] : memref<192xi32, #tpu.memory_space<smem>>
      %c1_i32_48 = arith.constant 1 : i32
      %78 = arith.addi %74, %c1_i32_48 : i32
      %79 = arith.index_cast %78 : i32 to index
      %80 = memref.load %arg1[%79] : memref<192xi32, #tpu.memory_space<smem>>
      %c2_i32_49 = arith.constant 2 : i32
      %81 = arith.addi %74, %c2_i32_49 : i32
      %82 = arith.index_cast %81 : i32 to index
      %83 = memref.load %arg1[%82] : memref<192xi32, #tpu.memory_space<smem>>
      %c0_i32_50 = arith.constant 0 : i32
      %84 = arith.addi %c0_i32_50, %80 : i32
      %85 = arith.index_cast %84 : i32 to index
      %c0_51 = arith.constant 0 : index
      %86 = vector.load %arg10[%85, %c0_51] : memref<64x128xf32, #tpu.memory_space<vmem>>, vector<1x128xf32>
      %c0_52 = arith.constant 0 : index
      %c0_53 = arith.constant 0 : index
      %87 = vector.load %arg11[%c0_52, %c0_53] : memref<8x128xf32, #tpu.memory_space<vmem>>, vector<1x128xf32>
      tpu.vector_store %arg11[%c0_52, %c0_53], %86 {strides = array<i32>} : memref<8x128xf32, #tpu.memory_space<vmem>>, vector<1x128xf32>,
      %c0_i32_54 = arith.constant 0 : i32
      %88 = arith.addi %c0_i32_54, %83 : i32
      %89 = arith.index_cast %88 : i32 to index
      %c0_55 = arith.constant 0 : index
      %90 = vector.load %arg10[%89, %c0_55] : memref<64x128xf32, #tpu.memory_space<vmem>>, vector<1x128xf32>
      %c0_56 = arith.constant 0 : index
      %c0_57 = arith.constant 0 : index
      %91 = vector.load %arg12[%c0_56, %c0_57] : memref<8x128xf32, #tpu.memory_space<vmem>>, vector<1x128xf32>
      tpu.vector_store %arg12[%c0_56, %c0_57], %90 {strides = array<i32>} : memref<8x128xf32, #tpu.memory_space<vmem>>, vector<1x128xf32>,
      %92 = arith.index_cast %71 : i32 to index
      %93 = memref.load %arg2[%92] : memref<8xi32, #tpu.memory_space<smem>>
      %94 = arith.cmpi slt, %arg14, %93 : i32
      %95 = arith.cmpi ne, %80, %83 : i32
      %96 = arith.andi %94, %95 : i1
      %c8_i32_58 = arith.constant 8 : i32
      %97 = arith.muli %arg0, %c8_i32_58 : i32
      %c1_i32_59 = arith.constant 1 : i32
      %98 = arith.addi %97, %c1_i32_59 : i32
      %c24_i32_60 = arith.constant 24 : i32
      %99 = arith.muli %98, %c24_i32_60 : i32
      %c3_i32_61 = arith.constant 3 : i32
      %100 = arith.muli %arg14, %c3_i32_61 : i32
      %101 = arith.addi %99, %100 : i32
      %c0_i32_62 = arith.constant 0 : i32
      %102 = arith.addi %101, %c0_i32_62 : i32
      %103 = arith.index_cast %102 : i32 to index
      %104 = memref.load %arg1[%103] : memref<192xi32, #tpu.memory_space<smem>>
      %c1_i32_63 = arith.constant 1 : i32
      %105 = arith.addi %101, %c1_i32_63 : i32
      %106 = arith.index_cast %105 : i32 to index
      %107 = memref.load %arg1[%106] : memref<192xi32, #tpu.memory_space<smem>>
      %c2_i32_64 = arith.constant 2 : i32
      %108 = arith.addi %101, %c2_i32_64 : i32
      %109 = arith.index_cast %108 : i32 to index
      %110 = memref.load %arg1[%109] : memref<192xi32, #tpu.memory_space<smem>>
      %c8_i32_65 = arith.constant 8 : i32
      %111 = arith.addi %c8_i32_65, %107 : i32
      %112 = arith.index_cast %111 : i32 to index
      %c0_66 = arith.constant 0 : index
      %113 = vector.load %arg10[%112, %c0_66] : memref<64x128xf32, #tpu.memory_space<vmem>>, vector<1x128xf32>
      %c1_67 = arith.constant 1 : index
      %c0_68 = arith.constant 0 : index
      %114 = vector.load %arg11[%c1_67, %c0_68] : memref<8x128xf32, #tpu.memory_space<vmem>>, vector<1x128xf32>
      tpu.vector_store %arg11[%c1_67, %c0_68], %113 {strides = array<i32>} : memref<8x128xf32, #tpu.memory_space<vmem>>, vector<1x128xf32>,
      %c8_i32_69 = arith.constant 8 : i32
      %115 = arith.addi %c8_i32_69, %110 : i32
      %116 = arith.index_cast %115 : i32 to index
      %c0_70 = arith.constant 0 : index
      %117 = vector.load %arg10[%116, %c0_70] : memref<64x128xf32, #tpu.memory_space<vmem>>, vector<1x128xf32>
      %c1_71 = arith.constant 1 : index
      %c0_72 = arith.constant 0 : index
      %118 = vector.load %arg12[%c1_71, %c0_72] : memref<8x128xf32, #tpu.memory_space<vmem>>, vector<1x128xf32>
      tpu.vector_store %arg12[%c1_71, %c0_72], %117 {strides = array<i32>} : memref<8x128xf32, #tpu.memory_space<vmem>>, vector<1x128xf32>,
      %119 = arith.index_cast %98 : i32 to index
      %120 = memref.load %arg2[%119] : memref<8xi32, #tpu.memory_space<smem>>
      %121 = arith.cmpi slt, %arg14, %120 : i32
      %122 = arith.cmpi ne, %107, %110 : i32
      %123 = arith.andi %121, %122 : i1
      %c8_i32_73 = arith.constant 8 : i32
      %124 = arith.muli %arg0, %c8_i32_73 : i32
      %c2_i32_74 = arith.constant 2 : i32
      %125 = arith.addi %124, %c2_i32_74 : i32
      %c24_i32_75 = arith.constant 24 : i32
      %126 = arith.muli %125, %c24_i32_75 : i32
      %c3_i32_76 = arith.constant 3 : i32
      %127 = arith.muli %arg14, %c3_i32_76 : i32
      %128 = arith.addi %126, %127 : i32
      %c0_i32_77 = arith.constant 0 : i32
      %129 = arith.addi %128, %c0_i32_77 : i32
      %130 = arith.index_cast %129 : i32 to index
      %131 = memref.load %arg1[%130] : memref<192xi32, #tpu.memory_space<smem>>
      %c1_i32_78 = arith.constant 1 : i32
      %132 = arith.addi %128, %c1_i32_78 : i32
      %133 = arith.index_cast %132 : i32 to index
      %134 = memref.load %arg1[%133] : memref<192xi32, #tpu.memory_space<smem>>
      %c2_i32_79 = arith.constant 2 : i32
      %135 = arith.addi %128, %c2_i32_79 : i32
      %136 = arith.index_cast %135 : i32 to index
      %137 = memref.load %arg1[%136] : memref<192xi32, #tpu.memory_space<smem>>
      %c16_i32 = arith.constant 16 : i32
      %138 = arith.addi %c16_i32, %134 : i32
      %139 = arith.index_cast %138 : i32 to index
      %c0_80 = arith.constant 0 : index
      %140 = vector.load %arg10[%139, %c0_80] : memref<64x128xf32, #tpu.memory_space<vmem>>, vector<1x128xf32>
      %c2_81 = arith.constant 2 : index
      %c0_82 = arith.constant 0 : index
      %141 = vector.load %arg11[%c2_81, %c0_82] : memref<8x128xf32, #tpu.memory_space<vmem>>, vector<1x128xf32>
      tpu.vector_store %arg11[%c2_81, %c0_82], %140 {strides = array<i32>} : memref<8x128xf32, #tpu.memory_space<vmem>>, vector<1x128xf32>,
      %c16_i32_83 = arith.constant 16 : i32
      %142 = arith.addi %c16_i32_83, %137 : i32
      %143 = arith.index_cast %142 : i32 to index
      %c0_84 = arith.constant 0 : index
      %144 = vector.load %arg10[%143, %c0_84] : memref<64x128xf32, #tpu.memory_space<vmem>>, vector<1x128xf32>
      %c2_85 = arith.constant 2 : index
      %c0_86 = arith.constant 0 : index
      %145 = vector.load %arg12[%c2_85, %c0_86] : memref<8x128xf32, #tpu.memory_space<vmem>>, vector<1x128xf32>
      tpu.vector_store %arg12[%c2_85, %c0_86], %144 {strides = array<i32>} : memref<8x128xf32, #tpu.memory_space<vmem>>, vector<1x128xf32>,
      %146 = arith.index_cast %125 : i32 to index
      %147 = memref.load %arg2[%146] : memref<8xi32, #tpu.memory_space<smem>>
      %148 = arith.cmpi slt, %arg14, %147 : i32
      %149 = arith.cmpi ne, %134, %137 : i32
      %150 = arith.andi %148, %149 : i1
      %c8_i32_87 = arith.constant 8 : i32
      %151 = arith.muli %arg0, %c8_i32_87 : i32
      %c3_i32_88 = arith.constant 3 : i32
      %152 = arith.addi %151, %c3_i32_88 : i32
      %c24_i32_89 = arith.constant 24 : i32
      %153 = arith.muli %152, %c24_i32_89 : i32
      %c3_i32_90 = arith.constant 3 : i32
      %154 = arith.muli %arg14, %c3_i32_90 : i32
      %155 = arith.addi %153, %154 : i32
      %c0_i32_91 = arith.constant 0 : i32
      %156 = arith.addi %155, %c0_i32_91 : i32
      %157 = arith.index_cast %156 : i32 to index
      %158 = memref.load %arg1[%157] : memref<192xi32, #tpu.memory_space<smem>>
      %c1_i32_92 = arith.constant 1 : i32
      %159 = arith.addi %155, %c1_i32_92 : i32
      %160 = arith.index_cast %159 : i32 to index
      %161 = memref.load %arg1[%160] : memref<192xi32, #tpu.memory_space<smem>>
      %c2_i32_93 = arith.constant 2 : i32
      %162 = arith.addi %155, %c2_i32_93 : i32
      %163 = arith.index_cast %162 : i32 to index
      %164 = memref.load %arg1[%163] : memref<192xi32, #tpu.memory_space<smem>>
      %c24_i32_94 = arith.constant 24 : i32
      %165 = arith.addi %c24_i32_94, %161 : i32
      %166 = arith.index_cast %165 : i32 to index
      %c0_95 = arith.constant 0 : index
      %167 = vector.load %arg10[%166, %c0_95] : memref<64x128xf32, #tpu.memory_space<vmem>>, vector<1x128xf32>
      %c3_96 = arith.constant 3 : index
      %c0_97 = arith.constant 0 : index
      %168 = vector.load %arg11[%c3_96, %c0_97] : memref<8x128xf32, #tpu.memory_space<vmem>>, vector<1x128xf32>
      tpu.vector_store %arg11[%c3_96, %c0_97], %167 {strides = array<i32>} : memref<8x128xf32, #tpu.memory_space<vmem>>, vector<1x128xf32>,
      %c24_i32_98 = arith.constant 24 : i32
      %169 = arith.addi %c24_i32_98, %164 : i32
      %170 = arith.index_cast %169 : i32 to index
      %c0_99 = arith.constant 0 : index
      %171 = vector.load %arg10[%170, %c0_99] : memref<64x128xf32, #tpu.memory_space<vmem>>, vector<1x128xf32>
      %c3_100 = arith.constant 3 : index
      %c0_101 = arith.constant 0 : index
      %172 = vector.load %arg12[%c3_100, %c0_101] : memref<8x128xf32, #tpu.memory_space<vmem>>, vector<1x128xf32>
      tpu.vector_store %arg12[%c3_100, %c0_101], %171 {strides = array<i32>} : memref<8x128xf32, #tpu.memory_space<vmem>>, vector<1x128xf32>,
      %173 = arith.index_cast %152 : i32 to index
      %174 = memref.load %arg2[%173] : memref<8xi32, #tpu.memory_space<smem>>
      %175 = arith.cmpi slt, %arg14, %174 : i32
      %176 = arith.cmpi ne, %161, %164 : i32
      %177 = arith.andi %175, %176 : i1
      %c8_i32_102 = arith.constant 8 : i32
      %178 = arith.muli %arg0, %c8_i32_102 : i32
      %c4_i32_103 = arith.constant 4 : i32
      %179 = arith.addi %178, %c4_i32_103 : i32
      %c24_i32_104 = arith.constant 24 : i32
      %180 = arith.muli %179, %c24_i32_104 : i32
      %c3_i32_105 = arith.constant 3 : i32
      %181 = arith.muli %arg14, %c3_i32_105 : i32
      %182 = arith.addi %180, %181 : i32
      %c0_i32_106 = arith.constant 0 : i32
      %183 = arith.addi %182, %c0_i32_106 : i32
      %184 = arith.index_cast %183 : i32 to index
      %185 = memref.load %arg1[%184] : memref<192xi32, #tpu.memory_space<smem>>
      %c1_i32_107 = arith.constant 1 : i32
      %186 = arith.addi %182, %c1_i32_107 : i32
      %187 = arith.index_cast %186 : i32 to index
      %188 = memref.load %arg1[%187] : memref<192xi32, #tpu.memory_space<smem>>
      %c2_i32_108 = arith.constant 2 : i32
      %189 = arith.addi %182, %c2_i32_108 : i32
      %190 = arith.index_cast %189 : i32 to index
      %191 = memref.load %arg1[%190] : memref<192xi32, #tpu.memory_space<smem>>
      %c32_i32 = arith.constant 32 : i32
      %192 = arith.addi %c32_i32, %188 : i32
      %193 = arith.index_cast %192 : i32 to index
      %c0_109 = arith.constant 0 : index
      %194 = vector.load %arg10[%193, %c0_109] : memref<64x128xf32, #tpu.memory_space<vmem>>, vector<1x128xf32>
      %c4_110 = arith.constant 4 : index
      %c0_111 = arith.constant 0 : index
      %195 = vector.load %arg11[%c4_110, %c0_111] : memref<8x128xf32, #tpu.memory_space<vmem>>, vector<1x128xf32>
      tpu.vector_store %arg11[%c4_110, %c0_111], %194 {strides = array<i32>} : memref<8x128xf32, #tpu.memory_space<vmem>>, vector<1x128xf32>,
      %c32_i32_112 = arith.constant 32 : i32
      %196 = arith.addi %c32_i32_112, %191 : i32
      %197 = arith.index_cast %196 : i32 to index
      %c0_113 = arith.constant 0 : index
      %198 = vector.load %arg10[%197, %c0_113] : memref<64x128xf32, #tpu.memory_space<vmem>>, vector<1x128xf32>
      %c4_114 = arith.constant 4 : index
      %c0_115 = arith.constant 0 : index
      %199 = vector.load %arg12[%c4_114, %c0_115] : memref<8x128xf32, #tpu.memory_space<vmem>>, vector<1x128xf32>
      tpu.vector_store %arg12[%c4_114, %c0_115], %198 {strides = array<i32>} : memref<8x128xf32, #tpu.memory_space<vmem>>, vector<1x128xf32>,
      %200 = arith.index_cast %179 : i32 to index
      %201 = memref.load %arg2[%200] : memref<8xi32, #tpu.memory_space<smem>>
      %202 = arith.cmpi slt, %arg14, %201 : i32
      %203 = arith.cmpi ne, %188, %191 : i32
      %204 = arith.andi %202, %203 : i1
      %c8_i32_116 = arith.constant 8 : i32
      %205 = arith.muli %arg0, %c8_i32_116 : i32
      %c5_i32_117 = arith.constant 5 : i32
      %206 = arith.addi %205, %c5_i32_117 : i32
      %c24_i32_118 = arith.constant 24 : i32
      %207 = arith.muli %206, %c24_i32_118 : i32
      %c3_i32_119 = arith.constant 3 : i32
      %208 = arith.muli %arg14, %c3_i32_119 : i32
      %209 = arith.addi %207, %208 : i32
      %c0_i32_120 = arith.constant 0 : i32
      %210 = arith.addi %209, %c0_i32_120 : i32
      %211 = arith.index_cast %210 : i32 to index
      %212 = memref.load %arg1[%211] : memref<192xi32, #tpu.memory_space<smem>>
      %c1_i32_121 = arith.constant 1 : i32
      %213 = arith.addi %209, %c1_i32_121 : i32
      %214 = arith.index_cast %213 : i32 to index
      %215 = memref.load %arg1[%214] : memref<192xi32, #tpu.memory_space<smem>>
      %c2_i32_122 = arith.constant 2 : i32
      %216 = arith.addi %209, %c2_i32_122 : i32
      %217 = arith.index_cast %216 : i32 to index
      %218 = memref.load %arg1[%217] : memref<192xi32, #tpu.memory_space<smem>>
      %c40_i32 = arith.constant 40 : i32
      %219 = arith.addi %c40_i32, %215 : i32
      %220 = arith.index_cast %219 : i32 to index
      %c0_123 = arith.constant 0 : index
      %221 = vector.load %arg10[%220, %c0_123] : memref<64x128xf32, #tpu.memory_space<vmem>>, vector<1x128xf32>
      %c5_124 = arith.constant 5 : index
      %c0_125 = arith.constant 0 : index
      %222 = vector.load %arg11[%c5_124, %c0_125] : memref<8x128xf32, #tpu.memory_space<vmem>>, vector<1x128xf32>
      tpu.vector_store %arg11[%c5_124, %c0_125], %221 {strides = array<i32>} : memref<8x128xf32, #tpu.memory_space<vmem>>, vector<1x128xf32>,
      %c40_i32_126 = arith.constant 40 : i32
      %223 = arith.addi %c40_i32_126, %218 : i32
      %224 = arith.index_cast %223 : i32 to index
      %c0_127 = arith.constant 0 : index
      %225 = vector.load %arg10[%224, %c0_127] : memref<64x128xf32, #tpu.memory_space<vmem>>, vector<1x128xf32>
      %c5_128 = arith.constant 5 : index
      %c0_129 = arith.constant 0 : index
      %226 = vector.load %arg12[%c5_128, %c0_129] : memref<8x128xf32, #tpu.memory_space<vmem>>, vector<1x128xf32>
      tpu.vector_store %arg12[%c5_128, %c0_129], %225 {strides = array<i32>} : memref<8x128xf32, #tpu.memory_space<vmem>>, vector<1x128xf32>,
      %227 = arith.index_cast %206 : i32 to index
      %228 = memref.load %arg2[%227] : memref<8xi32, #tpu.memory_space<smem>>
      %229 = arith.cmpi slt, %arg14, %228 : i32
      %230 = arith.cmpi ne, %215, %218 : i32
      %231 = arith.andi %229, %230 : i1
      %c8_i32_130 = arith.constant 8 : i32
      %232 = arith.muli %arg0, %c8_i32_130 : i32
      %c6_i32_131 = arith.constant 6 : i32
      %233 = arith.addi %232, %c6_i32_131 : i32
      %c24_i32_132 = arith.constant 24 : i32
      %234 = arith.muli %233, %c24_i32_132 : i32
      %c3_i32_133 = arith.constant 3 : i32
      %235 = arith.muli %arg14, %c3_i32_133 : i32
      %236 = arith.addi %234, %235 : i32
      %c0_i32_134 = arith.constant 0 : i32
      %237 = arith.addi %236, %c0_i32_134 : i32
      %238 = arith.index_cast %237 : i32 to index
      %239 = memref.load %arg1[%238] : memref<192xi32, #tpu.memory_space<smem>>
      %c1_i32_135 = arith.constant 1 : i32
      %240 = arith.addi %236, %c1_i32_135 : i32
      %241 = arith.index_cast %240 : i32 to index
      %242 = memref.load %arg1[%241] : memref<192xi32, #tpu.memory_space<smem>>
      %c2_i32_136 = arith.constant 2 : i32
      %243 = arith.addi %236, %c2_i32_136 : i32
      %244 = arith.index_cast %243 : i32 to index
      %245 = memref.load %arg1[%244] : memref<192xi32, #tpu.memory_space<smem>>
      %c48_i32 = arith.constant 48 : i32
      %246 = arith.addi %c48_i32, %242 : i32
      %247 = arith.index_cast %246 : i32 to index
      %c0_137 = arith.constant 0 : index
      %248 = vector.load %arg10[%247, %c0_137] : memref<64x128xf32, #tpu.memory_space<vmem>>, vector<1x128xf32>
      %c6_138 = arith.constant 6 : index
      %c0_139 = arith.constant 0 : index
      %249 = vector.load %arg11[%c6_138, %c0_139] : memref<8x128xf32, #tpu.memory_space<vmem>>, vector<1x128xf32>
      tpu.vector_store %arg11[%c6_138, %c0_139], %248 {strides = array<i32>} : memref<8x128xf32, #tpu.memory_space<vmem>>, vector<1x128xf32>,
      %c48_i32_140 = arith.constant 48 : i32
      %250 = arith.addi %c48_i32_140, %245 : i32
      %251 = arith.index_cast %250 : i32 to index
      %c0_141 = arith.constant 0 : index
      %252 = vector.load %arg10[%251, %c0_141] : memref<64x128xf32, #tpu.memory_space<vmem>>, vector<1x128xf32>
      %c6_142 = arith.constant 6 : index
      %c0_143 = arith.constant 0 : index
      %253 = vector.load %arg12[%c6_142, %c0_143] : memref<8x128xf32, #tpu.memory_space<vmem>>, vector<1x128xf32>
      tpu.vector_store %arg12[%c6_142, %c0_143], %252 {strides = array<i32>} : memref<8x128xf32, #tpu.memory_space<vmem>>, vector<1x128xf32>,
      %254 = arith.index_cast %233 : i32 to index
      %255 = memref.load %arg2[%254] : memref<8xi32, #tpu.memory_space<smem>>
      %256 = arith.cmpi slt, %arg14, %255 : i32
      %257 = arith.cmpi ne, %242, %245 : i32
      %258 = arith.andi %256, %257 : i1
      %c8_i32_144 = arith.constant 8 : i32
      %259 = arith.muli %arg0, %c8_i32_144 : i32
      %c7_i32_145 = arith.constant 7 : i32
      %260 = arith.addi %259, %c7_i32_145 : i32
      %c24_i32_146 = arith.constant 24 : i32
      %261 = arith.muli %260, %c24_i32_146 : i32
      %c3_i32_147 = arith.constant 3 : i32
      %262 = arith.muli %arg14, %c3_i32_147 : i32
      %263 = arith.addi %261, %262 : i32
      %c0_i32_148 = arith.constant 0 : i32
      %264 = arith.addi %263, %c0_i32_148 : i32
      %265 = arith.index_cast %264 : i32 to index
      %266 = memref.load %arg1[%265] : memref<192xi32, #tpu.memory_space<smem>>
      %c1_i32_149 = arith.constant 1 : i32
      %267 = arith.addi %263, %c1_i32_149 : i32
      %268 = arith.index_cast %267 : i32 to index
      %269 = memref.load %arg1[%268] : memref<192xi32, #tpu.memory_space<smem>>
      %c2_i32_150 = arith.constant 2 : i32
      %270 = arith.addi %263, %c2_i32_150 : i32
      %271 = arith.index_cast %270 : i32 to index
      %272 = memref.load %arg1[%271] : memref<192xi32, #tpu.memory_space<smem>>
      %c56_i32 = arith.constant 56 : i32
      %273 = arith.addi %c56_i32, %269 : i32
      %274 = arith.index_cast %273 : i32 to index
      %c0_151 = arith.constant 0 : index
      %275 = vector.load %arg10[%274, %c0_151] : memref<64x128xf32, #tpu.memory_space<vmem>>, vector<1x128xf32>
      %c7_152 = arith.constant 7 : index
      %c0_153 = arith.constant 0 : index
      %276 = vector.load %arg11[%c7_152, %c0_153] : memref<8x128xf32, #tpu.memory_space<vmem>>, vector<1x128xf32>
      tpu.vector_store %arg11[%c7_152, %c0_153], %275 {strides = array<i32>} : memref<8x128xf32, #tpu.memory_space<vmem>>, vector<1x128xf32>,
      %c56_i32_154 = arith.constant 56 : i32
      %277 = arith.addi %c56_i32_154, %272 : i32
      %278 = arith.index_cast %277 : i32 to index
      %c0_155 = arith.constant 0 : index
      %279 = vector.load %arg10[%278, %c0_155] : memref<64x128xf32, #tpu.memory_space<vmem>>, vector<1x128xf32>
      %c7_156 = arith.constant 7 : index
      %c0_157 = arith.constant 0 : index
      %280 = vector.load %arg12[%c7_156, %c0_157] : memref<8x128xf32, #tpu.memory_space<vmem>>, vector<1x128xf32>
      tpu.vector_store %arg12[%c7_156, %c0_157], %279 {strides = array<i32>} : memref<8x128xf32, #tpu.memory_space<vmem>>, vector<1x128xf32>,
      %281 = arith.index_cast %260 : i32 to index
      %282 = memref.load %arg2[%281] : memref<8xi32, #tpu.memory_space<smem>>
      %283 = arith.cmpi slt, %arg14, %282 : i32
      %284 = arith.cmpi ne, %269, %272 : i32
      %285 = arith.andi %283, %284 : i1
      %c0_158 = arith.constant 0 : index
      %c0_159 = arith.constant 0 : index
      %286 = vector.load %arg11[%c0_158, %c0_159] : memref<8x128xf32, #tpu.memory_space<vmem>>, vector<8x128xf32>
      %287 = arith.truncf %286 : vector<8x128xf32> to vector<8x128xbf16>
      %cst_160 = arith.constant dense<0.000000e+00> : vector<8x128xf32>
      %288 = tpu.matmul %287, %3, %cst_160 {dimension_numbers = #tpu.dot_dimension_numbers<[1], [0], [0], [1], [0, 0, 1, 1], [], []>} : vector<8x128xbf16>, vector<128x128xbf16>, vector<8x128xf32> -> vector<8x128xf32>
      %c0_161 = arith.constant 0 : index
      %c0_162 = arith.constant 0 : index
      %289 = vector.load %arg12[%c0_161, %c0_162] : memref<8x128xf32, #tpu.memory_space<vmem>>, vector<8x128xf32>
      %290 = arith.truncf %289 : vector<8x128xf32> to vector<8x128xbf16>
      %cst_163 = arith.constant dense<0.000000e+00> : vector<8x128xf32>
      %291 = tpu.matmul %290, %4, %cst_163 {dimension_numbers = #tpu.dot_dimension_numbers<[1], [0], [0], [1], [0, 0, 1, 1], [], []>} : vector<8x128xbf16>, vector<128x128xbf16>, vector<8x128xf32> -> vector<8x128xf32>
      %292 = arith.addf %288, %291 : vector<8x128xf32>
      %293 = vector.broadcast %5 : vector<1x128xf32> to vector<8x128xf32>
      %294 = arith.addf %292, %293 : vector<8x128xf32>
      %295 = math.tanh %294 : vector<8x128xf32>
      %296 = vector.extract_strided_slice %295 {offsets = [0, 0], sizes = [1, 128], strides = [1, 1]} : vector<8x128xf32> to vector<1x128xf32>
      %297 = arith.extui %96 : i1 to i32
      %c0_i32_164 = arith.constant 0 : i32
      %298 = arith.cmpi ne, %297, %c0_i32_164 : i32
      scf.if %298 {
        %c0_i32_172 = arith.constant 0 : i32
        %320 = arith.addi %c0_i32_172, %77 : i32
        %321 = arith.index_cast %320 : i32 to index
        %c0_173 = arith.constant 0 : index
        %322 = vector.load %arg10[%321, %c0_173] : memref<64x128xf32, #tpu.memory_space<vmem>>, vector<1x128xf32>
        tpu.vector_store %arg10[%321, %c0_173], %296 {strides = array<i32>} : memref<64x128xf32, #tpu.memory_space<vmem>>, vector<1x128xf32>,
      } else {
      }
      %299 = vector.extract_strided_slice %295 {offsets = [1, 0], sizes = [1, 128], strides = [1, 1]} : vector<8x128xf32> to vector<1x128xf32>
      %300 = arith.extui %123 : i1 to i32
      %c0_i32_165 = arith.constant 0 : i32
      %301 = arith.cmpi ne, %300, %c0_i32_165 : i32
      scf.if %301 {
        %c8_i32_172 = arith.constant 8 : i32
        %320 = arith.addi %c8_i32_172, %104 : i32
        %321 = arith.index_cast %320 : i32 to index
        %c0_173 = arith.constant 0 : index
        %322 = vector.load %arg10[%321, %c0_173] : memref<64x128xf32, #tpu.memory_space<vmem>>, vector<1x128xf32>
        tpu.vector_store %arg10[%321, %c0_173], %299 {strides = array<i32>} : memref<64x128xf32, #tpu.memory_space<vmem>>, vector<1x128xf32>,
      } else {
      }
      %302 = vector.extract_strided_slice %295 {offsets = [2, 0], sizes = [1, 128], strides = [1, 1]} : vector<8x128xf32> to vector<1x128xf32>
      %303 = arith.extui %150 : i1 to i32
      %c0_i32_166 = arith.constant 0 : i32
      %304 = arith.cmpi ne, %303, %c0_i32_166 : i32
      scf.if %304 {
        %c16_i32_172 = arith.constant 16 : i32
        %320 = arith.addi %c16_i32_172, %131 : i32
        %321 = arith.index_cast %320 : i32 to index
        %c0_173 = arith.constant 0 : index
        %322 = vector.load %arg10[%321, %c0_173] : memref<64x128xf32, #tpu.memory_space<vmem>>, vector<1x128xf32>
        tpu.vector_store %arg10[%321, %c0_173], %302 {strides = array<i32>} : memref<64x128xf32, #tpu.memory_space<vmem>>, vector<1x128xf32>,
      } else {
      }
      %305 = vector.extract_strided_slice %295 {offsets = [3, 0], sizes = [1, 128], strides = [1, 1]} : vector<8x128xf32> to vector<1x128xf32>
      %306 = arith.extui %177 : i1 to i32
      %c0_i32_167 = arith.constant 0 : i32
      %307 = arith.cmpi ne, %306, %c0_i32_167 : i32
      scf.if %307 {
        %c24_i32_172 = arith.constant 24 : i32
        %320 = arith.addi %c24_i32_172, %158 : i32
        %321 = arith.index_cast %320 : i32 to index
        %c0_173 = arith.constant 0 : index
        %322 = vector.load %arg10[%321, %c0_173] : memref<64x128xf32, #tpu.memory_space<vmem>>, vector<1x128xf32>
        tpu.vector_store %arg10[%321, %c0_173], %305 {strides = array<i32>} : memref<64x128xf32, #tpu.memory_space<vmem>>, vector<1x128xf32>,
      } else {
      }
      %308 = vector.extract_strided_slice %295 {offsets = [4, 0], sizes = [1, 128], strides = [1, 1]} : vector<8x128xf32> to vector<1x128xf32>
      %309 = arith.extui %204 : i1 to i32
      %c0_i32_168 = arith.constant 0 : i32
      %310 = arith.cmpi ne, %309, %c0_i32_168 : i32
      scf.if %310 {
        %c32_i32_172 = arith.constant 32 : i32
        %320 = arith.addi %c32_i32_172, %185 : i32
        %321 = arith.index_cast %320 : i32 to index
        %c0_173 = arith.constant 0 : index
        %322 = vector.load %arg10[%321, %c0_173] : memref<64x128xf32, #tpu.memory_space<vmem>>, vector<1x128xf32>
        tpu.vector_store %arg10[%321, %c0_173], %308 {strides = array<i32>} : memref<64x128xf32, #tpu.memory_space<vmem>>, vector<1x128xf32>,
      } else {
      }
      %311 = vector.extract_strided_slice %295 {offsets = [5, 0], sizes = [1, 128], strides = [1, 1]} : vector<8x128xf32> to vector<1x128xf32>
      %312 = arith.extui %231 : i1 to i32
      %c0_i32_169 = arith.constant 0 : i32
      %313 = arith.cmpi ne, %312, %c0_i32_169 : i32
      scf.if %313 {
        %c40_i32_172 = arith.constant 40 : i32
        %320 = arith.addi %c40_i32_172, %212 : i32
        %321 = arith.index_cast %320 : i32 to index
        %c0_173 = arith.constant 0 : index
        %322 = vector.load %arg10[%321, %c0_173] : memref<64x128xf32, #tpu.memory_space<vmem>>, vector<1x128xf32>
        tpu.vector_store %arg10[%321, %c0_173], %311 {strides = array<i32>} : memref<64x128xf32, #tpu.memory_space<vmem>>, vector<1x128xf32>,
      } else {
      }
      %314 = vector.extract_strided_slice %295 {offsets = [6, 0], sizes = [1, 128], strides = [1, 1]} : vector<8x128xf32> to vector<1x128xf32>
      %315 = arith.extui %258 : i1 to i32
      %c0_i32_170 = arith.constant 0 : i32
      %316 = arith.cmpi ne, %315, %c0_i32_170 : i32
      scf.if %316 {
        %c48_i32_172 = arith.constant 48 : i32
        %320 = arith.addi %c48_i32_172, %239 : i32
        %321 = arith.index_cast %320 : i32 to index
        %c0_173 = arith.constant 0 : index
        %322 = vector.load %arg10[%321, %c0_173] : memref<64x128xf32, #tpu.memory_space<vmem>>, vector<1x128xf32>
        tpu.vector_store %arg10[%321, %c0_173], %314 {strides = array<i32>} : memref<64x128xf32, #tpu.memory_space<vmem>>, vector<1x128xf32>,
      } else {
      }
      %317 = vector.extract_strided_slice %295 {offsets = [7, 0], sizes = [1, 128], strides = [1, 1]} : vector<8x128xf32> to vector<1x128xf32>
      %318 = arith.extui %285 : i1 to i32
      %c0_i32_171 = arith.constant 0 : i32
      %319 = arith.cmpi ne, %318, %c0_i32_171 : i32
      scf.if %319 {
        %c56_i32_172 = arith.constant 56 : i32
        %320 = arith.addi %c56_i32_172, %266 : i32
        %321 = arith.index_cast %320 : i32 to index
        %c0_173 = arith.constant 0 : index
        %322 = vector.load %arg10[%321, %c0_173] : memref<64x128xf32, #tpu.memory_space<vmem>>, vector<1x128xf32>
        tpu.vector_store %arg10[%321, %c0_173], %317 {strides = array<i32>} : memref<64x128xf32, #tpu.memory_space<vmem>>, vector<1x128xf32>,
      } else {
      }
    }
    %c0_18 = arith.constant 0 : index
    %c0_19 = arith.constant 0 : index
    %46 = vector.load %arg10[%c0_18, %c0_19] : memref<64x128xf32, #tpu.memory_space<vmem>>, vector<1x128xf32>
    %c0_20 = arith.constant 0 : index
    %c0_21 = arith.constant 0 : index
    %47 = vector.load %arg13[%c0_20, %c0_21] : memref<8x128xf32, #tpu.memory_space<vmem>>, vector<1x128xf32>
    tpu.vector_store %arg13[%c0_20, %c0_21], %46 {strides = array<i32>} : memref<8x128xf32, #tpu.memory_space<vmem>>, vector<1x128xf32>,
    %c8 = arith.constant 8 : index
    %c0_22 = arith.constant 0 : index
    %48 = vector.load %arg10[%c8, %c0_22] : memref<64x128xf32, #tpu.memory_space<vmem>>, vector<1x128xf32>
    %c1 = arith.constant 1 : index
    %c0_23 = arith.constant 0 : index
    %49 = vector.load %arg13[%c1, %c0_23] : memref<8x128xf32, #tpu.memory_space<vmem>>, vector<1x128xf32>
    tpu.vector_store %arg13[%c1, %c0_23], %48 {strides = array<i32>} : memref<8x128xf32, #tpu.memory_space<vmem>>, vector<1x128xf32>,
    %c16 = arith.constant 16 : index
    %c0_24 = arith.constant 0 : index
    %50 = vector.load %arg10[%c16, %c0_24] : memref<64x128xf32, #tpu.memory_space<vmem>>, vector<1x128xf32>
    %c2 = arith.constant 2 : index
    %c0_25 = arith.constant 0 : index
    %51 = vector.load %arg13[%c2, %c0_25] : memref<8x128xf32, #tpu.memory_space<vmem>>, vector<1x128xf32>
    tpu.vector_store %arg13[%c2, %c0_25], %50 {strides = array<i32>} : memref<8x128xf32, #tpu.memory_space<vmem>>, vector<1x128xf32>,
    %c24 = arith.constant 24 : index
    %c0_26 = arith.constant 0 : index
    %52 = vector.load %arg10[%c24, %c0_26] : memref<64x128xf32, #tpu.memory_space<vmem>>, vector<1x128xf32>
    %c3 = arith.constant 3 : index
    %c0_27 = arith.constant 0 : index
    %53 = vector.load %arg13[%c3, %c0_27] : memref<8x128xf32, #tpu.memory_space<vmem>>, vector<1x128xf32>
    tpu.vector_store %arg13[%c3, %c0_27], %52 {strides = array<i32>} : memref<8x128xf32, #tpu.memory_space<vmem>>, vector<1x128xf32>,
    %c32 = arith.constant 32 : index
    %c0_28 = arith.constant 0 : index
    %54 = vector.load %arg10[%c32, %c0_28] : memref<64x128xf32, #tpu.memory_space<vmem>>, vector<1x128xf32>
    %c4 = arith.constant 4 : index
    %c0_29 = arith.constant 0 : index
    %55 = vector.load %arg13[%c4, %c0_29] : memref<8x128xf32, #tpu.memory_space<vmem>>, vector<1x128xf32>
    tpu.vector_store %arg13[%c4, %c0_29], %54 {strides = array<i32>} : memref<8x128xf32, #tpu.memory_space<vmem>>, vector<1x128xf32>,
    %c40 = arith.constant 40 : index
    %c0_30 = arith.constant 0 : index
    %56 = vector.load %arg10[%c40, %c0_30] : memref<64x128xf32, #tpu.memory_space<vmem>>, vector<1x128xf32>
    %c5 = arith.constant 5 : index
    %c0_31 = arith.constant 0 : index
    %57 = vector.load %arg13[%c5, %c0_31] : memref<8x128xf32, #tpu.memory_space<vmem>>, vector<1x128xf32>
    tpu.vector_store %arg13[%c5, %c0_31], %56 {strides = array<i32>} : memref<8x128xf32, #tpu.memory_space<vmem>>, vector<1x128xf32>,
    %c48 = arith.constant 48 : index
    %c0_32 = arith.constant 0 : index
    %58 = vector.load %arg10[%c48, %c0_32] : memref<64x128xf32, #tpu.memory_space<vmem>>, vector<1x128xf32>
    %c6 = arith.constant 6 : index
    %c0_33 = arith.constant 0 : index
    %59 = vector.load %arg13[%c6, %c0_33] : memref<8x128xf32, #tpu.memory_space<vmem>>, vector<1x128xf32>
    tpu.vector_store %arg13[%c6, %c0_33], %58 {strides = array<i32>} : memref<8x128xf32, #tpu.memory_space<vmem>>, vector<1x128xf32>,
    %c56 = arith.constant 56 : index
    %c0_34 = arith.constant 0 : index
    %60 = vector.load %arg10[%c56, %c0_34] : memref<64x128xf32, #tpu.memory_space<vmem>>, vector<1x128xf32>
    %c7 = arith.constant 7 : index
    %c0_35 = arith.constant 0 : index
    %61 = vector.load %arg13[%c7, %c0_35] : memref<8x128xf32, #tpu.memory_space<vmem>>, vector<1x128xf32>
    tpu.vector_store %arg13[%c7, %c0_35], %60 {strides = array<i32>} : memref<8x128xf32, #tpu.memory_space<vmem>>, vector<1x128xf32>,
    %c0_36 = arith.constant 0 : index
    %c0_37 = arith.constant 0 : index
    %62 = vector.load %arg13[%c0_36, %c0_37] : memref<8x128xf32, #tpu.memory_space<vmem>>, vector<8x128xf32>
    %63 = arith.truncf %62 : vector<8x128xf32> to vector<8x128xbf16>
    %c0_38 = arith.constant 0 : index
    %c0_39 = arith.constant 0 : index
    %64 = vector.load %arg7[%c0_38, %c0_39] : memref<128x128xbf16, #tpu.memory_space<vmem>>, vector<128x128xbf16>
    %cst = arith.constant dense<0.000000e+00> : vector<8x128xf32>
    %65 = tpu.matmul %63, %64, %cst {dimension_numbers = #tpu.dot_dimension_numbers<[1], [0], [0], [1], [0, 0, 1, 1], [], []>} : vector<8x128xbf16>, vector<128x128xbf16>, vector<8x128xf32> -> vector<8x128xf32>
    %c0_40 = arith.constant 0 : index
    %c0_41 = arith.constant 0 : index
    %66 = vector.load %arg8[%c0_40, %c0_41] : memref<1x128xf32, #tpu.memory_space<vmem>>, vector<1x128xf32>
    %67 = vector.broadcast %66 : vector<1x128xf32> to vector<8x128xf32>
    %68 = arith.addf %65, %67 : vector<8x128xf32>
    %c0_42 = arith.constant 0 : index
    %c0_43 = arith.constant 0 : index
    %69 = vector.load %arg9[%c0_42, %c0_43] : memref<8x128xf32, #tpu.memory_space<vmem>>, vector<8x128xf32>
    tpu.vector_store %arg9[%c0_42, %c0_43], %68 {strides = array<i32>} : memref<8x128xf32, #tpu.memory_space<vmem>>, vector<8x128xf32>,
    return
  }
  func.func @transform_0(%arg0: i32, %arg1: memref<192xi32, #tpu.memory_space<smem>>, %arg2: memref<8xi32, #tpu.memory_space<smem>>) -> (i32, i32) {
    %c0_i32 = arith.constant 0 : i32
    %c0_i32_0 = arith.constant 0 : i32
    return %arg0, %c0_i32 : i32, i32
  }
  func.func @transform_1(%arg0: i32, %arg1: memref<192xi32, #tpu.memory_space<smem>>, %arg2: memref<8xi32, #tpu.memory_space<smem>>) -> (i32, i32) {
    %c0_i32 = arith.constant 0 : i32
    %c0_i32_0 = arith.constant 0 : i32
    %c0_i32_1 = arith.constant 0 : i32
    return %c0_i32, %c0_i32_0 : i32, i32
  }
  func.func @transform_2(%arg0: i32, %arg1: memref<192xi32, #tpu.memory_space<smem>>, %arg2: memref<8xi32, #tpu.memory_space<smem>>) -> (i32, i32) {
    %c0_i32 = arith.constant 0 : i32
    %c0_i32_0 = arith.constant 0 : i32
    %c0_i32_1 = arith.constant 0 : i32
    return %c0_i32, %c0_i32_0 : i32, i32
  }
  func.func @transform_3(%arg0: i32, %arg1: memref<192xi32, #tpu.memory_space<smem>>, %arg2: memref<8xi32, #tpu.memory_space<smem>>) -> (i32, i32) {
    %c0_i32 = arith.constant 0 : i32
    %c0_i32_0 = arith.constant 0 : i32
    %c0_i32_1 = arith.constant 0 : i32
    return %c0_i32, %c0_i32_0 : i32, i32
  }
  func.func @transform_4(%arg0: i32, %arg1: memref<192xi32, #tpu.memory_space<smem>>, %arg2: memref<8xi32, #tpu.memory_space<smem>>) -> (i32, i32) {
    %c0_i32 = arith.constant 0 : i32
    %c0_i32_0 = arith.constant 0 : i32
    %c0_i32_1 = arith.constant 0 : i32
    return %c0_i32, %c0_i32_0 : i32, i32
  }
  func.func @transform_5(%arg0: i32, %arg1: memref<192xi32, #tpu.memory_space<smem>>, %arg2: memref<8xi32, #tpu.memory_space<smem>>) -> (i32, i32) {
    %c0_i32 = arith.constant 0 : i32
    %c0_i32_0 = arith.constant 0 : i32
    %c0_i32_1 = arith.constant 0 : i32
    return %c0_i32, %c0_i32_0 : i32, i32
  }
  func.func @transform_6(%arg0: i32, %arg1: memref<192xi32, #tpu.memory_space<smem>>, %arg2: memref<8xi32, #tpu.memory_space<smem>>) -> (i32, i32) {
    %c0_i32 = arith.constant 0 : i32
    %c0_i32_0 = arith.constant 0 : i32
    return %arg0, %c0_i32 : i32, i32
  }
}

</mosaic_0001>

<bundles_post_ra>
// kernel: tpu_custom_call.1
= control target key start
LH: loop header
LB: loop body
LE: loop exit
PB: predicated region body
PF: predicated region fallthrough
CT: control target
= control target key end

     0   :  { %s1050_s11 = smov [#allocation7]   ;;  %s1051_s12 = smov [#allocation8]   ;;  %s1450_s0 = inlined_call_operand.hbm [shape: s32[192], index: 0, kind: input, shape index: {}]   ;;  %s1451_s2 = inlined_call_operand.hbm [shape: bf16[64,128], index: 2, kind: input, shape index: {}]   ;;  %s1452_s3 = inlined_call_operand.hbm [shape: bf16[128,128], index: 3, kind: input, shape index: {}]   ;;  %s1453_s4 = inlined_call_operand.hbm [shape: bf16[128,128], index: 4, kind: input, shape index: {}]   ;;  %s1454_s5 = inlined_call_operand.vmem [shape: f32[1,128], index: 5, kind: input, shape index: {}]   ;;  %s1455_s6 = inlined_call_operand.hbm [shape: bf16[128,128], index: 6, kind: input, shape index: {}]   ;;  %s1456_s7 = inlined_call_operand.vmem [shape: f32[1,128], index: 7, kind: input, shape index: {}]   ;;  %s1457_s8 = inlined_call_operand.hbm [shape: f32[8,128], index: 8, kind: output, shape index: {}]   ;;  %s1458_s1 = inlined_call_operand.hbm [shape: s32[8], index: 1, kind: input, shape index: {}]  }
   0x1   :  { %1460 = sst [smem:[#allocation28_spill]] %s1456_s7  ;;  %s14_s29 = sshll.u32 %s1450_s0, 4  ;;  %s15_s29 = int_to_ptr.hbm [resolvable:$true] %s14_s29 }
   0x2   :  { %1461 = sst [smem:[#allocation29_spill]] %s1457_s8  ;;  %s19_s10 = sshll.u32 %s1458_s1, 4  ;;  %s20_s10 = int_to_ptr.hbm [resolvable:$true] %s19_s10 }
   0x3   :  { %17 = dma.hbm_to_smem %s15_s29, 32, %s1050_s11, [#allocation6] }
   0x4   :  { %22 = dma.hbm_to_smem %s20_s10, 16, %s1051_s12, [#allocation6] }
   0x5   :  { %1036 = dma.done.wait [#allocation6], 48 }
   0x6   :  { %1037 = vsyncadd [#allocation6], 4294967248 }
   0x7   :  { %25 = sfence }
   0x8   :  { %26 = vsyncpa [#allocation10], 0 }
   0x9   :  { %27 = vsyncpa [#allocation13], 0 }
   0xa   :  { %28 = vsyncpa [#allocation16], 0 }
   0xb   :  { %29 = vsyncpa [#allocation11], 0  ;;  %s47_s0 = sshll.u32 %s1452_s3, 4  ;;  %s1052_s15 = smov [#allocation12]   ;;  %s48_s0 = int_to_ptr.hbm [resolvable:$true] %s47_s0 }
   0xc   :  { %s49_s1 = sshll.u32 %s1052_s15, 4  ;;  %s34_s18 = sshll.u32 %s1451_s2, 4  ;;  %s50_s1 = int_to_ptr.vmem [resolvable:$true] %s49_s1  ;;  %s35_s18 = int_to_ptr.hbm [resolvable:$true] %s34_s18 }
   0xd   :  { %s1053_s19 = smov 64   ;;  %s1054_s20 = smov 4  }
   0xe   :  { %55 = dma.hbm_to_vmem [thread:$0]  %s48_s0, 1024, %s50_s1, [#allocation13], %s1053_s19, %s1053_s19, %s1054_s20  }
   0xf   :  { %s1055_s21 = smov [#allocation9]   ;;  %s60_s25 = sshll.u32 %s1453_s4, 4  ;;  %s61_s25 = int_to_ptr.hbm [resolvable:$true] %s60_s25 }
  0x10   :  { %s36_s22 = sshll.u32 %s1055_s21, 4  ;;  %s75_s27 = sshll.u32 %s1455_s6, 4  ;;  %s37_s22 = int_to_ptr.vmem [resolvable:$true] %s36_s22  ;;  %s76_s27 = int_to_ptr.hbm [resolvable:$true] %s75_s27 }
  0x11   :  { %42 = dma.hbm_to_vmem [thread:$0]  %s35_s18, 512, %s37_s22, [#allocation10], %s1053_s19, %s1053_s19, %s1054_s20  }
  0x12   :  { %s1056_s28 = smov [#allocation14]   ;;  %s1057_s2 = smov [#allocation15]  }
  0x13   :  { %s62_s29 = sshll.u32 %s1056_s28, 4  ;;  %s77_s30 = sshll.u32 %s1057_s2, 4  ;;  %s63_s29 = int_to_ptr.vmem [resolvable:$true] %s62_s29  ;;  %s78_s30 = int_to_ptr.vmem [resolvable:$true] %s77_s30 }
  0x14   :  { %68 = dma.hbm_to_vmem [thread:$0]  %s61_s25, 1024, %s63_s29, [#allocation13], %s1053_s19, %s1053_s19, %s1054_s20  }
  0x15   :  { %83 = dma.hbm_to_vmem [thread:$0]  %s76_s27, 1024, %s78_s30, [#allocation16], %s1053_s19, %s1053_s19, %s1054_s20  }
  0x16   :  { %1038 = dma.done.wait [#allocation10], 512  }
  0x17   :  { %1039 = vsyncadd [#allocation10], 4294966784 }
  0x18   :  { %1040 = dma.done.wait [#allocation13], 2048  }
  0x19   :  { %1041 = vsyncadd [#allocation13], 4294965248 }
  0x1a   :  { %1042 = dma.done.wait [#allocation16], 1024  }
  0x1b   :  { %1043 = vsyncadd [#allocation16], 4294966272  ;;  %s160_s4 = sld [smem:[#allocation8]]  ;;  %v1130_v0 = vld [vmem:[#allocation12] sm:$0xf]  ;;  %v865_v34 = vld [vmem:[#allocation9 + $0x8] sm:$0xff]  }
  0x1c   :  { %s693_s9 = sld [smem:[#allocation8 + $0x1]]  ;;  %v1132_v1 = vld [vmem:[#allocation12] sm:$0xf0]  ;;  %v1134_v2 = vld [vmem:[#allocation12 + $0x8] sm:$0xf]  ;;  %v866_v35 = vld [vmem:[#allocation9 + $0x10] sm:$0xff]   ;;  %v855_v38 = vunpack.c.l.bf16 %v865_v34  ;;  %v856_v39 = vunpack.c.h.bf16 %v865_v34 }
  0x1d   :  { %s1122_s10 = sld [smem:[#allocation8 + $0x2]]  ;;  %v1136_v3 = vld [vmem:[#allocation12 + $0x8] sm:$0xf0]  ;;  %v1138_v4 = vld [vmem:[#allocation12 + $0x10] sm:$0xf]  ;;  %v850_v33 = vld [vmem:[#allocation9] sm:$0xff]   ;;  %v859_v41 = vunpack.c.l.bf16 %v866_v35  ;;  %v860_v42 = vunpack.c.h.bf16 %v866_v35 }
  0x1e   :  { %s1124_s6 = sld [smem:[#allocation8 + $0x3]]  ;;  %v1140_v5 = vld [vmem:[#allocation12 + $0x10] sm:$0xf0]  ;;  %v1142_v6 = vld [vmem:[#allocation12 + $0x18] sm:$0xf]  ;;  %v851_v36 = vunpack.c.l.bf16 %v850_v33  ;;  %v852_v37 = vunpack.c.h.bf16 %v850_v33  ;;  %120 = vst [vmem:[#allocation2 + $0x10] sm:$0xff] %v855_v38 }
  0x1f   :  { %s1126_s11 = sld [smem:[#allocation8 + $0x4]]  ;;  %v1144_v7 = vld [vmem:[#allocation12 + $0x18] sm:$0xf0]  ;;  %v1146_v8 = vld [vmem:[#allocation12 + $0x20] sm:$0xf]  ;;  %121 = vst [vmem:[#allocation2 + $0x18] sm:$0xff] %v856_v39 }
  0x20   :  { %s1128_s12 = sld [smem:[#allocation8 + $0x5]]  ;;  %v1148_v9 = vld [vmem:[#allocation12 + $0x20] sm:$0xf0]  ;;  %v1150_v10 = vld [vmem:[#allocation12 + $0x28] sm:$0xf]  ;;  %v867_v40 = vld [vmem:[#allocation9 + $0x18] sm:$0xff]  }
  0x21   :  { %v1152_v11 = vld [vmem:[#allocation12 + $0x28] sm:$0xf0]  ;;  %v1154_v12 = vld [vmem:[#allocation12 + $0x30] sm:$0xf]  ;;  %v1156_v13 = vld [vmem:[#allocation12 + $0x30] sm:$0xf0]  ;;  %v863_v43 = vunpack.c.l.bf16 %v867_v40  ;;  %v864_v44 = vunpack.c.h.bf16 %v867_v40 }
  0x22   :  { %p163_p0 = scmp.gt.s32.totalorder %s160_s4, %s693_s9  ;;  %v1158_v14 = vld [vmem:[#allocation12 + $0x38] sm:$0xf]  ;;  %v1160_v15 = vld [vmem:[#allocation12 + $0x38] sm:$0xf0]  ;;  %v1162_v16 = vld [vmem:[#allocation14] sm:$0xf] }
  0x23   :  { %v1164_v17 = vld [vmem:[#allocation14] sm:$0xf0]  ;;  %v1167_v18 = vld [vmem:[#allocation14 + $0x8] sm:$0xf]  ;;  %v1169_v19 = vld [vmem:[#allocation14 + $0x8] sm:$0xf0] }
  0x24   :  { %s1483_s4 = smov (!%p163_p0, %s160_s4), %s693_s9  ;;  %v1171_v20 = vld [vmem:[#allocation14 + $0x10] sm:$0xf]  ;;  %v1173_v21 = vld [vmem:[#allocation14 + $0x10] sm:$0xf0]  ;;  %v1175_v22 = vld [vmem:[#allocation14 + $0x18] sm:$0xf] }
  0x25   :  { %p167_p1 = scmp.gt.s32.totalorder %s1483_s4, %s1122_s10  ;;  %v1177_v23 = vld [vmem:[#allocation14 + $0x18] sm:$0xf0]  ;;  %v1180_v24 = vld [vmem:[#allocation14 + $0x20] sm:$0xf]  ;;  %v1182_v25 = vld [vmem:[#allocation14 + $0x20] sm:$0xf0] }
  0x26   :  { %v1184_v26 = vld [vmem:[#allocation14 + $0x28] sm:$0xf]  ;;  %v1186_v27 = vld [vmem:[#allocation14 + $0x28] sm:$0xf0]  ;;  %v1188_v28 = vld [vmem:[#allocation14 + $0x30] sm:$0xf] }
  0x27   :  { %s1485_s4 = smov (!%p167_p1, %s1483_s4), %s1122_s10  ;;  %v1190_v29 = vld [vmem:[#allocation14 + $0x30] sm:$0xf0]  ;;  %v1193_v30 = vld [vmem:[#allocation14 + $0x38] sm:$0xf]  ;;  %v1195_v31 = vld [vmem:[#allocation14 + $0x38] sm:$0xf0] }
  0x28   :  { %p171_p2 = scmp.gt.s32.totalorder %s1485_s4, %s1124_s6  ;;  %v1200_v32 = vld [vmem:[%s1454_s5] sm:$0x1]  ;;  %s698_s0 = sld [smem:[#allocation8 + $0x6]]  ;;  %118 = vst [vmem:[#allocation2] sm:$0xff] %v851_v36 }
  0x29   :  { %119 = vst [vmem:[#allocation2 + $0x8] sm:$0xff] %v852_v37  ;;  %s699_s5 = sld [smem:[#allocation8 + $0x7]] }
  0x2a   :  { %s1487_s4 = smov (!%p171_p2, %s1485_s4), %s1124_s6  ;;  %122 = vst [vmem:[#allocation2 + $0x20] sm:$0xff] %v859_v41 }
  0x2b   :  { %p175_p3 = scmp.gt.s32.totalorder %s1487_s4, %s1126_s11  ;;  %123 = vst [vmem:[#allocation2 + $0x28] sm:$0xff] %v860_v42 }
  0x2c   :  { %124 = vst [vmem:[#allocation2 + $0x30] sm:$0xff] %v863_v43 }
  0x2d   :  { %s1489_s4 = smov (!%p175_p3, %s1487_s4), %s1126_s11  ;;  %125 = vst [vmem:[#allocation2 + $0x38] sm:$0xff] %v864_v44 }
  0x2e   :  { %p179_p4 = scmp.gt.s32.totalorder %s1489_s4, %s1128_s12 }
  0x30   :  { %s1491_s4 = smov (!%p179_p4, %s1489_s4), %s1128_s12 }
  0x31   :  { %p183_p5 = scmp.gt.s32.totalorder %s1491_s4, %s698_s0 }
  0x33   :  { %s1493_s4 = smov (!%p183_p5, %s1491_s4), %s698_s0 }
  0x34   :  { %p187_p6 = scmp.gt.s32.totalorder %s1493_s4, %s699_s5 }
  0x36   :  { %s1495_s4 = smov (!%p187_p6, %s1493_s4), %s699_s5 }
  0x37   :  { %1462 = sst [smem:[#allocation23_spill]] %s1495_s4  ;;  %p700_p7 = scmp.le.s32.totalorder %s1495_s4, 0 }
  0x38   :  { %s1210_s15 = smov (!%p700_p7), 0  }
  0x39   :  { %690 = sbr.rel (%p700_p7) target bundleno = 324 (0x144), region = 117 }
  0x3e LB: > { %v753_v45 = vor.u32 %v1195_v31, %v1193_v30  ;;  %v785_v46 = vor.u32 %v1160_v15, %v1158_v14  ;;  %s1219_s1 = sld [smem:[#allocation8]]  ;;  %v749_v47 = vor.u32 %v1190_v29, %v1188_v28  ;;  %v781_v48 = vor.u32 %v1156_v13, %v1154_v12  ;;  %s1228_s17 = smul.u32 3, %s1048_s15  ;;  %s1048_s15 = sphi %s1210_s15, %s192_s15  }
  0x3f   : > { %s1221_s16 = sld [smem:[#allocation8 + $0x1]]  ;;  %v745_v49 = vor.u32 %v1186_v27, %v1184_v26  ;;  %v777_v50 = vor.u32 %v1152_v11, %v1150_v10  ;;  %v741_v51 = vor.u32 %v1182_v25, %v1180_v24  ;;  %v773_v52 = vor.u32 %v1148_v9, %v1146_v8 }
  0x40   : > { %406 = vmatpush.bf16.msra.mxu0 %v753_v45  ;;  %467 = vmatpush.bf16.msra.mxu1 %v785_v46  ;;  %s1230_s18 = sld [smem:[#allocation8 + $0x2]]  ;;  %s201_s21 = sadd.s32 2, %s1228_s17  ;;  %v737_v54 = vor.u32 %v1177_v23, %v1175_v22  ;;  %v769_v55 = vor.u32 %v1144_v7, %v1142_v6  ;;  %v733_v58 = vor.u32 %v1173_v21, %v1171_v20 }
  0x41   : > { %s1232_s19 = sld [smem:[#allocation8 + $0x3]]  ;;  %s1241_s23 = sadd.s32 24, %s1228_s17  ;;  %v765_v59 = vor.u32 %v1140_v5, %v1138_v4  ;;  %v729_v61 = vor.u32 %v1169_v19, %v1167_v18  ;;  %v761_v62 = vor.u32 %v1136_v3, %v1134_v2  ;;  %v725_v34 = vor.u32 %v1164_v17, %v1162_v16 }
  0x42   : > { %s1235_s20 = sld [smem:[#allocation7 + %s1228_s17]]  ;;  %s219_s25 = sadd.s32 2, %s1241_s23  ;;  %v757_v35 = vor.u32 %v1132_v1, %v1130_v0 }
  0x43   : > { %s1238_s22 = sld [smem:[#allocation7 + %s201_s21]]  ;;  %s1254_s26 = sadd.s32 48, %s1228_s17 }
  0x44   : > { %407 = vmatpush.bf16.msra.mxu0 %v749_v47  ;;  %468 = vmatpush.bf16.msra.mxu1 %v781_v48  ;;  %s1248_s24 = sld [smem:[#allocation7 + %s1241_s23]]  ;;  %s239_s28 = sadd.s32 2, %s1254_s26 }
  0x45   : > { %s1251_s3 = sld [smem:[#allocation7 + %s219_s25]]  ;;  %s1263_s2 = sadd.s32 72, %s1228_s17 }
  0x46   : > { %s1257_s27 = sld [smem:[#allocation7 + %s1254_s26]]  ;;  %s259_s9 = sadd.s32 2, %s1263_s2 }
  0x47   : > { %s1260_s29 = sld [smem:[#allocation7 + %s239_s28]]  ;;  %s1277_s11 = sadd.s32 96, %s1228_s17 }
  0x48   : > { %408 = vmatpush.bf16.msra.mxu0 %v745_v49  ;;  %469 = vmatpush.bf16.msra.mxu1 %v777_v50  ;;  %s1270_s30 = sld [smem:[#allocation7 + %s1263_s2]]  ;;  %s1280_s12 = sadd.s32 120, %s1228_s17 }
  0x49   : > { %s1273_s10 = sld [smem:[#allocation7 + %s259_s9]]  ;;  %s206_s6 = scalar_lea.vmem [#allocation2], %s1238_s22 }
  0x4a   : > { %v207_v53 = vld [vmem:[%s206_s6] sm:$0x1]  ;;  %s1283_s13 = sld [smem:[#allocation7 + %s1277_s11]]  ;;  %s279_s0 = sadd.s32 2, %s1277_s11 }
  0x4b   : > { %208 = vst [vmem:[#allocation4] sm:$0x1] %v207_v53  ;;  %s647_s14 = scalar_lea.vmem [#allocation2], %s1251_s3  ;;  %s1292_s5 = sld [smem:[#allocation7 + %s1280_s12]] }
  0x4c   : > { %409 = vmatpush.bf16.msra.mxu0 %v741_v51  ;;  %470 = vmatpush.bf16.msra.mxu1 %v773_v52  ;;  %v702_v56 = vld [vmem:[%s647_s14 + $0x8] sm:$0x1]  ;;  %s1294_s21 = sld [smem:[#allocation7 + %s279_s0]]  ;;  %s299_s28 = sadd.s32 2, %s1280_s12  ;;  %v481_v52 = vperm.slane %v1200_v32, 0 }
  0x4d   : > { %228 = vst [vmem:[#allocation4 + $0x1] sm:$0x1] %v702_v56  ;;  %s651_s25 = scalar_lea.vmem [#allocation2], %s1260_s29  ;;  %s1299_s9 = sadd.s32 144, %s1228_s17 }
  0x4e   : > { %v705_v57 = vld [vmem:[%s651_s25 + $0x10] sm:$0x1]  ;;  %s1301_s6 = sld [smem:[#allocation7 + %s299_s28]]  ;;  %s319_s25 = sadd.s32 2, %s1299_s9 }
  0x4f   : > { %248 = vst [vmem:[#allocation4 + $0x2] sm:$0x1] %v705_v57  ;;  %s655_s14 = scalar_lea.vmem [#allocation2], %s1273_s10  ;;  %s1309_s0 = sld [smem:[#allocation7 + %s1299_s9]] }
  0x50   : > { %1463 = sst [smem:[#allocation24_spill]] %s1283_s13  ;;  %410 = vmatpush.bf16.msra.mxu0 %v737_v54  ;;  %471 = vmatpush.bf16.msra.mxu1 %v769_v55  ;;  %v708_v60 = vld [vmem:[%s655_s14 + $0x18] sm:$0x1]  ;;  %s1315_s8 = sadd.s32 168, %s1228_s17 }
  0x51   : > { %1464 = sst [smem:[#allocation25_spill]] %s1292_s5  ;;  %268 = vst [vmem:[#allocation4 + $0x3] sm:$0x1] %v708_v60  ;;  %s339_s4 = sadd.s32 2, %s1315_s8 }
  0x52   : > { %s1312_s28 = sld [smem:[#allocation7 + %s319_s25]]  ;;  %s659_s25 = scalar_lea.vmem [#allocation2], %s1294_s21 }
  0x53   : > { %s1318_s7 = sld [smem:[#allocation7 + %s1315_s8]]  ;;  %v711_v63 = vld [vmem:[%s659_s25 + $0x20] sm:$0x1]  ;;  %p210_p8 = scmp.lt.s32.totalorder %s1048_s15, %s1219_s1 }
  0x54   : > { %s1321_s14 = sld [smem:[#allocation7 + %s339_s4]]  ;;  %411 = vmatpush.bf16.msra.mxu0 %v733_v58  ;;  %472 = vmatpush.bf16.msra.mxu1 %v765_v59  ;;  %288 = vst [vmem:[#allocation4 + $0x4] sm:$0x1] %v711_v63  ;;  %s663_s4 = scalar_lea.vmem [#allocation2], %s1301_s6 }
  0x55   : > { %1465 = sst [smem:[#allocation26_spill]] %s1309_s0  ;;  %s199_s0 = sadd.s32 1, %s1228_s17  ;;  %v714_v33 = vld [vmem:[%s663_s4 + $0x28] sm:$0x1] }
  0x56   : > { %s217_s5 = sadd.s32 1, %s1241_s23  ;;  %p230_p9 = scmp.lt.s32.totalorder %s1048_s15, %s1221_s16  ;;  %308 = vst [vmem:[#allocation4 + $0x5] sm:$0x1] %v714_v33 }
  0x57   : > { %s1337_s13 = sld [smem:[#allocation7 + %s217_s5]]  ;;  %s237_s23 = sadd.s32 1, %s1254_s26 }
  0x58   : > { %412 = vmatpush.bf16.msra.mxu0 %v729_v61  ;;  %473 = vmatpush.bf16.msra.mxu1 %v761_v62  ;;  %s667_s17 = scalar_lea.vmem [#allocation2], %s1312_s28  ;;  %p250_p10 = scmp.lt.s32.totalorder %s1048_s15, %s1230_s18 }
  0x59   : > { %1466 = sst [smem:[#allocation27_spill]] %s1318_s7  ;;  %v717_v36 = vld [vmem:[%s667_s17 + $0x30] sm:$0x1]  ;;  %s257_s25 = sadd.s32 1, %s1263_s2 }
  0x5a   : > { %s1331_s7 = sld [smem:[#allocation7 + %s199_s0]]  ;;  %328 = vst [vmem:[#allocation4 + $0x6] sm:$0x1] %v717_v36  ;;  %s671_s0 = scalar_lea.vmem [#allocation2], %s1321_s14 }
  0x5b   : > { %s238_s5 = sld [smem:[#allocation7 + %s237_s23]]  ;;  %v720_v37 = vld [vmem:[%s671_s0 + $0x38] sm:$0x1]  ;;  %p270_p11 = scmp.lt.s32.totalorder %s1048_s15, %s1232_s19 }
  0x5c   : > { %348 = vst [vmem:[#allocation4 + $0x7] sm:$0x1] %v720_v37  ;;  %413 = vmatpush.bf16.msra.mxu0 %v725_v34  ;;  %474 = vmatpush.bf16.msra.mxu1 %v757_v35  ;;  %s258_s4 = sld [smem:[#allocation7 + %s257_s25]]  ;;  %s277_s17 = sadd.s32 1, %s1277_s11 }
  0x5d   : > { %s645_s23 = scalar_lea.vmem [#allocation2], %s1337_s13  ;;  %p231_p0 = scmp.ne.s32.totalorder %s1337_s13, %s1251_s3 }
  0x5e   : > { %v701_v39 = vld [vmem:[%s645_s23 + $0x8] sm:$0x1]  ;;  %s712_s11 = sld [smem:[#allocation8 + $0x4]]  ;;  %s297_s3 = sadd.s32 1, %s1280_s12 }
  0x5f   : > { %224 = vst [vmem:[#allocation3 + $0x1] sm:$0x1] %v701_v39  ;;  %p1369_p2 = pnand %p231_p0, %p230_p9  ;;  %s317_s13 = sadd.s32 1, %s1299_s9 }
  0x60   : > { %p211_p12 = scmp.ne.s32.totalorder %s1331_s7, %s1238_s22  ;;  %s203_s26 = scalar_lea.vmem [#allocation2], %s1331_s7 }
  0x61   : > { %v204_v38 = vld [vmem:[%s203_s26] sm:$0x1]  ;;  %s278_s22 = sld [smem:[#allocation7 + %s277_s17]]  ;;  %p251_p1 = scmp.ne.s32.totalorder %s238_s5, %s1260_s29 }
  0x62   : > { %205 = vst [vmem:[#allocation3] sm:$0x1] %v204_v38  ;;  %p1358_p13 = pnand %p211_p12, %p210_p8  ;;  %s649_s1 = scalar_lea.vmem [#allocation2], %s238_s5 }
  0x63   : > { %v704_v40 = vld [vmem:[%s649_s1 + $0x10] sm:$0x1]  ;;  %p1376_p3 = pnand %p251_p1, %p250_p10  ;;  %v356_v41 = vld [vmem:[#allocation4] sm:$0xff]  ;;  %p271_p4 = scmp.ne.s32.totalorder %s258_s4, %s1273_s10 }
  0x64   : > { %244 = vst [vmem:[#allocation3 + $0x2] sm:$0x1] %v704_v40  ;;  %v357_v42 = vpack.c.bf16 %v356_v41, %v356_v41  ;;  %s653_s16 = scalar_lea.vmem [#allocation2], %s258_s4  ;;  %s298_s29 = sld [smem:[#allocation7 + %s297_s3]] }
  0x65   : > { %v707_v43 = vld [vmem:[%s653_s16 + $0x18] sm:$0x1]  ;;  %p1386_p5 = pnand %p271_p4, %p270_p11  ;;  %s715_s10 = sld [smem:[#allocation8 + $0x5]] }
  0x66   : > { %264 = vst [vmem:[#allocation3 + $0x3] sm:$0x1] %v707_v43  ;;  %414 = vmatmul.bf16.vlgmr.msra.gmra.mxu0 %v357_v42  ;;  %p290_p7 = scmp.lt.s32.totalorder %s1048_s15, %s712_s11  ;;  %s318_s12 = sld [smem:[#allocation7 + %s317_s13]] }
  0x67   : > { %s657_s18 = scalar_lea.vmem [#allocation2], %s278_s22  ;;  %p291_p6 = scmp.ne.s32.totalorder %s278_s22, %s1294_s21 }
  0x68   : > { %v710_v44 = vld [vmem:[%s657_s18 + $0x20] sm:$0x1]  ;;  %s718_s25 = sld [smem:[#allocation8 + $0x6]]  ;;  %s337_s9 = sadd.s32 1, %s1315_s8 }
  0x69   : > { %284 = vst [vmem:[#allocation3 + $0x4] sm:$0x1] %v710_v44  ;;  %p1393_p8 = pnand %p291_p6, %p290_p7  ;;  %s338_s26 = sld [smem:[#allocation7 + %s337_s9]] }
  0x6a   : > { %p311_p9 = scmp.ne.s32.totalorder %s298_s29, %s1301_s6  ;;  %s661_s4 = scalar_lea.vmem [#allocation2], %s298_s29 }
  0x6b   : > { %v713_v45 = vld [vmem:[%s661_s4 + $0x28] sm:$0x1]  ;;  %s721_s17 = sld [smem:[#allocation8 + $0x7]]  ;;  %p310_p10 = scmp.lt.s32.totalorder %s1048_s15, %s715_s10 }
  0x6c   : > { %304 = vst [vmem:[#allocation3 + $0x5] sm:$0x1] %v713_v45  ;;  %p331_p11 = scmp.ne.s32.totalorder %s318_s12, %s1312_s28  ;;  %s665_s23 = scalar_lea.vmem [#allocation2], %s318_s12 }
  0x6d   : > { %p1400_p12 = pnand %p311_p9, %p310_p10  ;;  %v716_v46 = vld [vmem:[%s665_s23 + $0x30] sm:$0x1]  ;;  %s487_s28 = scalar_lea.vmem (!%p1358_p13), [#allocation2], %s1235_s20 }
  0x6e   : > { %p330_p0 = scmp.lt.s32.totalorder %s1048_s15, %s718_s25  ;;  %324 = vst [vmem:[#allocation3 + $0x6] sm:$0x1] %v716_v46 }
  0x6f   : > { %p351_p1 = scmp.ne.s32.totalorder %s338_s26, %s1321_s14  ;;  %s669_s6 = scalar_lea.vmem [#allocation2], %s338_s26 }
  0x70   : > { %p1406_p4 = pnand %p331_p11, %p330_p0  ;;  %v719_v47 = vld [vmem:[%s669_s6 + $0x38] sm:$0x1] }
  0x71   : > { %344 = vst [vmem:[#allocation3 + $0x7] sm:$0x1] %v719_v47  ;;  %p350_p6 = scmp.lt.s32.totalorder %s1048_s15, %s721_s17 }
  0x73   : > { %p1411_p7 = pnand %p351_p1, %p350_p6 }
  0x78   : > { %v354_v48 = vld [vmem:[#allocation3] sm:$0xff] }
  0x79   : > { %v355_v49 = vpack.c.bf16 %v354_v48, %v354_v48 }
  0x7b   : > { %475 = vmatmul.bf16.vlgmr.msra.gmra.mxu1 %v355_v49 }
  0xe3   : > { %v415_v50 = vpop.f32.mrf.mxu0 }
  0xeb   : > { %v417_v51 = vpop.f32.mrf.mxu0 }
  0xf8   : > { %v476_v53 = vpop.f32.mrf.mxu1 }
  0xf9   : > { %v477_v54 = vadd.f32 %v476_v53, %v415_v50 }
  0xfb   : > { %v483_v55 = vadd.f32 %v481_v52, %v477_v54 }
  0xfd   : > { %885 = vtanh.f32 %v483_v55 }
  0xff   : > { %486 = sbr.rel (%p1358_p13) target bundleno = 261 (0x105), region = 52 }
 0x100   : > { %v478_v56 = vpop.f32.mrf.mxu1 }
 0x103   : > { %v886_v57 = vpop.eup %885 }
 0x104   : > { %488 = vst [vmem:[%s487_s28] sm:$0x1] %v886_v57 }
 0x105 PF: > { %490 = sbr.rel (%p1369_p2) target bundleno = 267 (0x10b), region = 56  ;;  %s674_s14 = scalar_lea.vmem (!%p1369_p2), [#allocation2], %s1248_s24 }
 0x10a   : > { %786 = vst [vmem:[%s674_s14 + $0x7] sm:$0x2] %v886_v57 }
 0x10b PF: > { %495 = sbr.rel (%p1376_p3) target bundleno = 273 (0x111), region = 60  ;;  %s676_s1 = scalar_lea.vmem (!%p1376_p3), [#allocation2], %s1257_s27 }
 0x110   : > { %787 = vst [vmem:[%s676_s1 + $0xe] sm:$0x4] %v886_v57 }
 0x111 PF: > { %500 = sbr.rel (%p1386_p5) target bundleno = 279 (0x117), region = 64  ;;  %s678_s20 = scalar_lea.vmem (!%p1386_p5), [#allocation2], %s1270_s30 }
 0x116   : > { %788 = vst [vmem:[%s678_s20 + $0x15] sm:$0x8] %v886_v57 }
 0x117 PF: > { %505 = sbr.rel (%p1393_p8) target bundleno = 287 (0x11f), region = 68  ;;  %s1475_s24 = sld [smem:[#allocation24_spill]] (!%p1393_p8) }
 0x11d   : > { %s680_s2 = scalar_lea.vmem [#allocation2], %s1475_s24 }
 0x11e   : > { %789 = vst [vmem:[%s680_s2 + $0x1c] sm:$0x10] %v886_v57 }
 0x11f PF: > { %510 = sbr.rel (%p1400_p12) target bundleno = 295 (0x127), region = 72  ;;  %s1476_s27 = sld [smem:[#allocation25_spill]] (!%p1400_p12) }
 0x125   : > { %s682_s7 = scalar_lea.vmem [#allocation2], %s1476_s27 }
 0x126   : > { %790 = vst [vmem:[%s682_s7 + $0x23] sm:$0x20] %v886_v57 }
 0x127 PF: > { %515 = sbr.rel (%p1406_p4) target bundleno = 303 (0x12f), region = 76  ;;  %s1477_s30 = sld [smem:[#allocation26_spill]] (!%p1406_p4) }
 0x12d   : > { %s684_s11 = scalar_lea.vmem [#allocation2], %s1477_s30 }
 0x12e   : > { %791 = vst [vmem:[%s684_s11 + $0x2a] sm:$0x40] %v886_v57 }
 0x12f PF: > { %520 = sbr.rel (%p1411_p7) target bundleno = 311 (0x137), region = 80  ;;  %s1478_s0 = sld [smem:[#allocation27_spill]] (!%p1411_p7) }
 0x135   : > { %s686_s3 = scalar_lea.vmem [#allocation2], %s1478_s0 }
 0x136   : > { %792 = vst [vmem:[%s686_s3 + $0x31] sm:$0x80] %v886_v57 }
 0x137 PF: > { %s192_s15 = sadd.s32 1, %s1048_s15   ;;  %s1479_s16 = sld [smem:[#allocation23_spill]] }
 0x13d   : > { %p191_p13 = scmp.ge.s32.totalorder %s192_s15, %s1479_s16 }
 0x13f   :  { %194 = sbr.rel (!%p191_p13) target bundleno = 62 (0x3e), region = 123 }
 0x144 PF:  { %v848_v58 = vld [vmem:[#allocation15 + $0x38] sm:$0xff]  ;;  %v847_v59 = vld [vmem:[#allocation15 + $0x30] sm:$0xff]  ;;  %v524_v60 = vld [vmem:[#allocation2] sm:$0x1]  ;;  %s1480_s13 = sld [smem:[#allocation28_spill]]  ;;  %s1058_s5 = smov [#allocation17]  }
 0x145   :  { %610 = vmatpush.bf16.msra.mxu0 %v848_v58  ;;  %525 = vst [vmem:[#allocation5] sm:$0x1] %v524_v60  ;;  %v526_v61 = vld [vmem:[#allocation2 + $0x8] sm:$0x1]  ;;  %v528_v62 = vld [vmem:[#allocation2 + $0x10] sm:$0x1] }
 0x146   :  { %527 = vst [vmem:[#allocation5 + $0x1] sm:$0x1] %v526_v61  ;;  %v530_v63 = vld [vmem:[#allocation2 + $0x18] sm:$0x1]  ;;  %v532_v33 = vld [vmem:[#allocation2 + $0x20] sm:$0x1] }
 0x147   :  { %v846_v34 = vld [vmem:[#allocation15 + $0x28] sm:$0xff]  ;;  %529 = vst [vmem:[#allocation5 + $0x2] sm:$0x1] %v528_v62  ;;  %v534_v35 = vld [vmem:[#allocation2 + $0x28] sm:$0x1]  ;;  %v845_v0 = vld [vmem:[#allocation15 + $0x20] sm:$0xff] }
 0x148   :  { %531 = vst [vmem:[#allocation5 + $0x3] sm:$0x1] %v530_v63  ;;  %v536_v36 = vld [vmem:[#allocation2 + $0x30] sm:$0x1]  ;;  %v538_v37 = vld [vmem:[#allocation2 + $0x38] sm:$0x1] }
 0x149   :  { %611 = vmatpush.bf16.msra.mxu0 %v847_v59  ;;  %533 = vst [vmem:[#allocation5 + $0x4] sm:$0x1] %v532_v33  ;;  %v844_v1 = vld [vmem:[#allocation15 + $0x18] sm:$0xff]  ;;  %v843_v2 = vld [vmem:[#allocation15 + $0x10] sm:$0xff]  ;;  %v842_v3 = vld [vmem:[#allocation15 + $0x8] sm:$0xff]  ;;  %s629_s18 = sshll.u32 %s1058_s5, 4  ;;  %s630_s18 = int_to_ptr.vmem [resolvable:$true] %s629_s18 }
 0x14a   :  { %535 = vst [vmem:[#allocation5 + $0x5] sm:$0x1] %v534_v35  ;;  %v841_v4 = vld [vmem:[#allocation15] sm:$0xff]  ;;  %v887_v7 = vld [vmem:[%s1480_s13] ss:$0 sm:$0xff]  ;;  %s1481_s25 = sld [smem:[#allocation29_spill]] }
 0x14b   :  { %537 = vst [vmem:[#allocation5 + $0x6] sm:$0x1] %v536_v36 }
 0x14c   :  { %539 = vst [vmem:[#allocation5 + $0x7] sm:$0x1] %v538_v37 }
 0x14d   :  { %612 = vmatpush.bf16.msra.mxu0 %v846_v34 }
 0x150   :  { %s631_s9 = sshll.u32 %s1481_s25, 4  ;;  %s632_s9 = int_to_ptr.hbm [resolvable:$true] %s631_s9 }
 0x151   :  { %613 = vmatpush.bf16.msra.mxu0 %v845_v0 }
 0x153   :  { %v540_v5 = vld [vmem:[#allocation5] sm:$0xff] }
 0x154   :  { %v541_v6 = vpack.c.bf16 %v540_v5, %v540_v5 }
 0x155   :  { %614 = vmatpush.bf16.msra.mxu0 %v844_v1 }
 0x159   :  { %615 = vmatpush.bf16.msra.mxu0 %v843_v2 }
 0x15d   :  { %616 = vmatpush.bf16.msra.mxu0 %v842_v3 }
 0x161   :  { %617 = vmatpush.bf16.msra.mxu0 %v841_v4 }
 0x164   :  { %618 = vmatmul.bf16.vlgmr.msra.gmra.mxu0 %v541_v6 }
 0x1e1   :  { %v619_v8 = vpop.f32.mrf.mxu0 }
 0x1e2   :  { %v620_v9 = vadd.f32 %v887_v7, %v619_v8 }
 0x1e4   :  { %623 = vst [vmem:[#allocation17] sm:$0xff] %v620_v9 }
 0x1e5   :  { %634 = dma.vmem_to_hbm [thread:$0]  %s630_s18, 128, %s632_s9, [#allocation11]  }
 0x1e9   :  { %v621_v10 = vpop.f32.mrf.mxu0 }
 0x1ea   :  { %1044 = dma.done.wait [#allocation11], 128  }
 0x1eb   :  { %1045 = vsyncadd [#allocation11], 4294967168 }
 0x1ec   :  { %639 = vsyncpa [#allocation10], 1 }
 0x1ed   :  { %640 = vsyncpa [#allocation13], 1 }
 0x1ee   :  { %641 = vsyncpa [#allocation16], 1 }
 0x1ef   :  { %642 = vsyncpa [#allocation11], 1 }

</bundles_post_ra>
